<compile_context>
chip_gen: v7x
topology: tpu7x:2x2x1
jax: 0.10.0
libtpu: 0.0.40
codegen_flags: <defaults>
</compile_context>

<pallas_src>
import functools

import numpy as np
import jax
import jax.numpy as jnp
from jax import lax
from jax.experimental import pallas as pl
from jax.experimental.pallas import tpu as pltpu

CLASS_NUM = 20
B = 2
DOWNSAMPLE = 64
IMG_SIZE = 448
LAMBDA_COORD = 5.0
LAMBDA_NOOBJ = 0.5

PRED_C = 5 * B + CLASS_NUM      # 30
GT_C = PRED_C + 2               # 32
LANES = 128
CH = 8                          # sublane chunk: one f32 vreg per channel slice
N_TERMS = 8                     # coord, pos_conf, neg_conf, class, n_pos, top1, top5, iou


def _yolo_loss_kernel(pred_ref, gt_ref, pos_ref, pat_ref, out_ref, *, n_real):
    """One cell-tile of the YOLO loss.

    pred_ref : (30, MT, 128)   gt_ref : (32, MT, 128)
    pos_ref  : (MT, 128)       pat_ref : (MT, 128)  (pred prob at gt class)
    out_ref  : (1, 64, 128)    eight (8, 128) per-lane partial-sum slabs:
       [coord, pos_conf, neg_conf, class_sq, n_pos, top1_hits, top5_hits, iou]
    """
    f32 = jnp.float32
    mt = pos_ref.shape[0]
    n_chunks = mt // CH
    g = pl.program_id(0)

    # Loop-invariant iota / scale constants, hoisted (JAX does not CSE broadcasts).
    m_iota = lax.broadcasted_iota(jnp.int32, (CH, LANES), 0)
    l_iota = lax.broadcasted_iota(jnp.int32, (CH, LANES), 1)
    flat_iota = m_iota * LANES + l_iota
    base = (g * mt) * LANES
    ds = float(DOWNSAMPLE)
    imgs = float(IMG_SIZE)
    imgmax = float(IMG_SIZE - 1)

    def chunk(i, acc):
        (a_coord, a_posconf, a_negconf, a_class,
         a_npos, a_top1, a_top5, a_iou) = acc
        off = pl.multiple_of(i * CH, CH)
        sl = pl.ds(off, CH)

        pos = pos_ref[sl, :]                                   # (CH, 128)
        # Lane-padding validity mask from the static real cell count.
        cell_idx = base + off * LANES + flat_iota
        valid = (cell_idx < n_real).astype(f32)
        neg = valid - pos                                      # pos implies valid

        # Ground-truth channels for this chunk.
        ox = gt_ref[30, sl, :]
        oy = gt_ref[31, sl, :]
        gx1 = gt_ref[5, sl, :]
        gy1 = gt_ref[6, sl, :]
        gx2 = gt_ref[7, sl, :]
        gy2 = gt_ref[8, sl, :]
        garea = gt_ref[9, sl, :]

        # Per predicted box: image-space box + intersection/union against gt.
        # Two-iteration Python loop (not a stacked (2,...) tensor) to keep the
        # peak number of live vregs low.
        boxes = []
        inters = []
        unions = []
        for b in range(B):
            o = 5 * b
            px = pred_ref[o + 0, sl, :]
            py = pred_ref[o + 1, sl, :]
            pw = pred_ref[o + 2, sl, :]
            ph = pred_ref[o + 3, sl, :]
            pc = pred_ref[o + 4, sl, :]
            cx = (px + ox) * ds
            cy = (py + oy) * ds
            w = pw * imgs
            h = ph * imgs
            hw = w * 0.5
            hh = h * 0.5
            x1 = jnp.maximum(0.0, cx - hw)
            y1 = jnp.maximum(0.0, cy - hh)
            x2 = jnp.minimum(imgmax, cx + hw)
            y2 = jnp.minimum(imgmax, cy + hh)
            area = w * h
            ix1 = jnp.maximum(x1, gx1)
            iy1 = jnp.maximum(y1, gy1)
            ix2 = jnp.minimum(x2, gx2)
            iy2 = jnp.minimum(y2, gy2)
            inter = jnp.where((ix1 < ix2) & (iy1 < iy2),
                              (ix2 - ix1) * (iy2 - iy1), 0.0)
            union = area + garea - inter
            boxes.append((px, py, pw, ph, pc))
            inters.append(inter)
            unions.append(union)

        # Responsible-box selection without dividing both IOUs:
        #   iou0 > iou1  <=>  inter0*union1 > inter1*union0  (unions >= 0).
        # Only the selected box's IOU is divided (one f32 divide per cell).
        first = inters[0] * unions[1] > inters[1] * unions[0]
        inter_r = jnp.where(first, inters[0], inters[1])
        union_r = jnp.where(first, unions[0], unions[1])
        iou_resp = jnp.where(union_r != 0.0, inter_r / union_r, 0.0)

        rx = jnp.where(first, boxes[0][0], boxes[1][0])
        ry = jnp.where(first, boxes[0][1], boxes[1][1])
        rw = jnp.where(first, boxes[0][2], boxes[1][2])
        rh = jnp.where(first, boxes[0][3], boxes[1][3])
        rc = jnp.where(first, boxes[0][4], boxes[1][4])
        nonresp_conf = jnp.where(first, boxes[1][4], boxes[0][4])

        # Coordinate loss (coord_loss_mode='default').
        # TODO(synk): iou/giou/diou/ciou coord-loss modes are not implemented.
        gnx = gt_ref[0, sl, :]
        gny = gt_ref[1, sl, :]
        gnw = gt_ref[2, sl, :]
        gnh = gt_ref[3, sl, :]
        coord = ((rx - gnx) ** 2 + (ry - gny) ** 2
                 + (jnp.sqrt(rw + 1e-8) - jnp.sqrt(gnw + 1e-8)) ** 2
                 + (jnp.sqrt(rh + 1e-8) - jnp.sqrt(gnh + 1e-8)) ** 2)
        pos_conf = (rc - 1.0) ** 2
        neg_conf = (nonresp_conf * nonresp_conf) * pos \
            + (boxes[0][4] ** 2 + boxes[1][4] ** 2) * neg

        # Class squared-error + class rank.  pred_at_gt is precomputed in the
        # wrapper (no per-cell iota/compare/select reduction in the kernel).
        # TODO(synk): compute_acc is not defined in the source module; the
        # standard rank-based top-1/top-5 definition is used.
        pred_at_gt = pat_ref[sl, :]
        class_sq = jnp.zeros((CH, LANES), f32)
        rank = jnp.zeros((CH, LANES), f32)
        for c in range(CLASS_NUM):
            pc_c = pred_ref[10 + c, sl, :]
            gc_c = gt_ref[10 + c, sl, :]
            d = pc_c - gc_c
            class_sq = class_sq + d * d
            rank = rank + (pc_c > pred_at_gt).astype(f32)
        top1 = (rank < 1.0).astype(f32)
        top5 = (rank < 5.0).astype(f32)

        return (a_coord + coord * pos,
                a_posconf + pos_conf * pos,
                a_negconf + neg_conf,
                a_class + class_sq * pos,
                a_npos + pos,
                a_top1 + top1 * pos,
                a_top5 + top5 * pos,
                a_iou + iou_resp * pos)

    zero = jnp.zeros((CH, LANES), jnp.float32)
    acc = lax.fori_loop(0, n_chunks, chunk, (zero,) * N_TERMS)

    # Eight unmasked full-vreg stores; sublane/lane/grid reduce in the wrapper.
    for k in range(N_TERMS):
        out_ref[0, k * CH:(k + 1) * CH, :] = acc[k]


@jax.jit
def yolo_loss(predict, ground_truth, gt_mask):
    """predict (bs, W, H, 30), ground_truth (bs, W, H, 32), gt_mask (bs, W, H) bool.

    Returns [loss, 5*coord, pos_conf, 0.5*neg_conf, class, top1, top5, iou_mean].
    """
    bs, W, H, C = predict.shape
    Cg = ground_truth.shape[-1]
    N = bs * W * H

    # Tile sizing: cap at 256 sublanes (double-buffered pred+gt ~16.5 MiB,
    # fits every generation incl. v7x's 64 MiB VMEM), aim for >= 2 grid steps
    # (so the "parallel" axis can feed both v7x TensorCores) with bounded padding.
    rows = -(-N // LANES)
    mt_target = -(-rows // 2)
    MT = min(256, max(CH, -(-mt_target // CH) * CH))
    block_cells = MT * LANES
    Npad = -(-N // block_cells) * block_cells
    M = Npad // LANES
    G = M // MT
    pad = Npad - N

    pred_flat = predict.reshape(N, C).astype(jnp.float32)
    gt_flat = ground_truth.reshape(N, Cg).astype(jnp.float32)
    # Precompute the predicted prob at the gt class as its own tiny input
    # (avoids appending a channel to gt, i.e. a full extra HBM pass on gt).
    gt_arg = jnp.argmax(gt_flat[:, 10:10 + CLASS_NUM], axis=1)
    pred_at_gt = jnp.take_along_axis(pred_flat[:, 10:10 + CLASS_NUM],
                                     gt_arg[:, None], axis=1)[:, 0]

    pred_p = jnp.pad(pred_flat, ((0, pad), (0, 0)))
    gt_p = jnp.pad(gt_flat, ((0, pad), (0, 0)))
    pos_p = jnp.pad(gt_mask.reshape(N).astype(jnp.float32), (0, pad))
    pat_p = jnp.pad(pred_at_gt, (0, pad))

    # (cells, C) -> channel-major (C, M, 128); cell i -> (i // 128, i % 128).
    # TODO(synk): for very large N this relayout is an extra HBM pass; emit the
    # channel-major layout directly from the producer of predict/ground_truth
    # when that matters (dominant remaining cost on v5e).
    pred_t = jnp.transpose(pred_p.reshape(M, LANES, C), (2, 0, 1))     # (30, M, 128)
    gt_t = jnp.transpose(gt_p.reshape(M, LANES, Cg), (2, 0, 1))        # (32, M, 128)
    pos_t = pos_p.reshape(M, LANES)
    pat_t = pat_p.reshape(M, LANES)

    partials = pl.pallas_call(
        functools.partial(_yolo_loss_kernel, n_real=N),
        out_shape=jax.ShapeDtypeStruct((G, N_TERMS * CH, LANES), jnp.float32),
        grid=(G,),
        in_specs=[
            pl.BlockSpec((C, MT, LANES), lambda g: (0, g, 0)),
            pl.BlockSpec((Cg, MT, LANES), lambda g: (0, g, 0)),
            pl.BlockSpec((MT, LANES), lambda g: (g, 0)),
            pl.BlockSpec((MT, LANES), lambda g: (g, 0)),
        ],
        out_specs=pl.BlockSpec((1, N_TERMS * CH, LANES), lambda g: (g, 0, 0)),
        compiler_params=pltpu.CompilerParams(
            dimension_semantics=("parallel",),        # independent blocks ->
            vmem_limit_bytes=32 * 1024 * 1024),       # megacore-shardable (v7x)
    )(pred_t, gt_t, pos_t, pat_t)

    # Final reductions + scalar normalization on 8 numbers (outside the kernel).
    raw = jnp.sum(partials.reshape(G, N_TERMS, CH, LANES), axis=(0, 2, 3))   # (8,)
    coord_s, posconf_s, negconf_s, class_s = raw[0], raw[1], raw[2], raw[3]
    n_pos, top1_s, top5_s, iou_s = raw[4], raw[5], raw[6], raw[7]

    inv_bs = 1.0 / bs
    coord_term = LAMBDA_COORD * coord_s * inv_bs
    pos_conf_loss = posconf_s * inv_bs
    noobj_term = LAMBDA_NOOBJ * negconf_s * inv_bs
    class_loss = class_s * (inv_bs / CLASS_NUM)
    # NOTE: with zero positive cells this yields +inf while the torch/numpy
    # reference (.mean() of an empty tensor) yields NaN -- degenerate case only.
    inv_npos = 1.0 / n_pos
    top1_acc = top1_s * inv_npos
    top5_acc = top5_s * inv_npos
    iou_mean = iou_s * inv_npos
    loss = coord_term + pos_conf_loss + noobj_term + class_loss
    return jnp.stack([loss, coord_term, pos_conf_loss, noobj_term,
                      class_loss, top1_acc, top5_acc, iou_mean])


def reference_numpy(predict, ground_truth, gt_mask):
    """Pure-numpy mirror of the torch forward (with actual boolean compaction)."""
    p = np.asarray(predict, dtype=np.float32)
    g = np.asarray(ground_truth, dtype=np.float32)
    m = np.asarray(gt_mask)
    bs = p.shape[0]
    pos_p, pos_g, neg_p = p[m], g[m], p[~m]
    b1, b2, pcls = pos_p[:, 0:5], pos_p[:, 5:10], pos_p[:, 10:]
    gtn, gtb, gcls = pos_g[:, 0:5], pos_g[:, 5:10], pos_g[:, 10:30]
    ox, oy = pos_g[:, 30], pos_g[:, 31]

    def imgbox(b):
        cx = (b[:, 0] + ox) * DOWNSAMPLE
        cy = (b[:, 1] + oy) * DOWNSAMPLE
        w = b[:, 2] * IMG_SIZE
        h = b[:, 3] * IMG_SIZE
        x1 = np.maximum(0.0, cx - w / 2)
        y1 = np.maximum(0.0, cy - h / 2)
        x2 = np.minimum(IMG_SIZE - 1.0, cx + w / 2)
        y2 = np.minimum(IMG_SIZE - 1.0, cy + h / 2)
        return np.stack([x1, y1, x2, y2, w * h], axis=1)

    def iou(a, t):
        ix1 = np.maximum(a[:, 0], t[:, 0]); iy1 = np.maximum(a[:, 1], t[:, 1])
        ix2 = np.minimum(a[:, 2], t[:, 2]); iy2 = np.minimum(a[:, 3], t[:, 3])
        inter = np.where((ix1 < ix2) & (iy1 < iy2),
                         (ix2 - ix1) * (iy2 - iy1), 0.0)
        return inter / (a[:, 4] + t[:, 4] - inter)

    i1, i2 = iou(imgbox(b1), gtb), iou(imgbox(b2), gtb)
    first = i1 > i2
    ioub = np.where(first, i1, i2)
    resp = np.where(first[:, None], b1, b2)
    nonresp = np.where(~first[:, None], b1, b2)

    coord = (((resp[:, 0] - gtn[:, 0]) ** 2).sum()
             + ((resp[:, 1] - gtn[:, 1]) ** 2).sum()
             + ((np.sqrt(resp[:, 2] + 1e-8) - np.sqrt(gtn[:, 2] + 1e-8)) ** 2).sum()
             + ((np.sqrt(resp[:, 3] + 1e-8) - np.sqrt(gtn[:, 3] + 1e-8)) ** 2).sum())
    coord_loss = coord / bs
    pos_conf_loss = ((resp[:, 4] - 1.0) ** 2).sum() / bs
    neg_boxes = np.concatenate([nonresp, neg_p[:, 0:10].reshape(-1, 5)], axis=0)
    neg_conf_loss = (neg_boxes[:, 4] ** 2).sum() / bs
    class_loss = ((pcls - gcls) ** 2).sum() / CLASS_NUM / bs

    gt_label = np.argmax(gcls, axis=1)
    pred_at_gt = pcls[np.arange(pcls.shape[0]), gt_label]
    rank = (pcls > pred_at_gt[:, None]).sum(axis=1)
    top1, top5 = (rank < 1).mean(), (rank < 5).mean()

    loss = (LAMBDA_COORD * coord_loss + pos_conf_loss
            + LAMBDA_NOOBJ * neg_conf_loss + class_loss)
    return np.array([loss, LAMBDA_COORD * coord_loss, pos_conf_loss,
                     LAMBDA_NOOBJ * neg_conf_loss, class_loss,
                     top1, top5, ioub.mean()], dtype=np.float32)


if __name__ == "__main__":
    key = jax.random.PRNGKey(0)
    bs, W, H = 2, 7, 7   # 448 / 64 = 7x7 grid
    k1, k2, k3, k4, k5, k6, k7 = jax.random.split(key, 7)

    predict = jax.random.uniform(k1, (bs, W, H, PRED_C), jnp.float32)

    gt_norm = jax.random.uniform(k2, (bs, W, H, 5), jnp.float32)
    x1 = jax.random.uniform(k3, (bs, W, H, 1), jnp.float32, 0.0, 200.0)
    y1 = jax.random.uniform(k4, (bs, W, H, 1), jnp.float32, 0.0, 200.0)
    wh = jax.random.uniform(k5, (bs, W, H, 2), jnp.float32, 50.0, 200.0)
    x2 = x1 + wh[..., 0:1]
    y2 = y1 + wh[..., 1:2]
    area = wh[..., 0:1] * wh[..., 1:2]
    gt_cls = jax.random.uniform(k6, (bs, W, H, CLASS_NUM), jnp.float32)
    gx = jnp.broadcast_to(jnp.arange(W, dtype=jnp.float32)[None, :, None, None],
                          (bs, W, H, 1))
    gy = jnp.broadcast_to(jnp.arange(H, dtype=jnp.float32)[None, None, :, None],
                          (bs, W, H, 1))
    ground_truth = jnp.concatenate(
        [gt_norm, x1, y1, x2, y2, area, gt_cls, gx, gy], axis=-1)  # (bs,W,H,32)

    gt_mask = jax.random.bernoulli(k7, 0.3, (bs, W, H))
    gt_mask = gt_mask.at[0, 0, 0].set(True)   # guarantee >= 1 positive cell

    out = jax.block_until_ready(yolo_loss(predict, ground_truth, gt_mask))
    ref = reference_numpy(predict, ground_truth, gt_mask)
    np.testing.assert_allclose(np.asarray(out), ref, rtol=2e-3, atol=2e-3)
    print("KERNEL_OK")
</pallas_src>

<mosaic_0001>
module attributes {stable_mosaic.version = 11 : i64} {
  func.func @_yolo_loss_kernel(%arg0: i32, %arg1: memref<30x8x128xf32, #tpu.memory_space<vmem>>, %arg2: memref<32x8x128xf32, #tpu.memory_space<vmem>>, %arg3: memref<8x128xf32, #tpu.memory_space<vmem>>, %arg4: memref<8x128xf32, #tpu.memory_space<vmem>>, %arg5: memref<1x64x128xf32, #tpu.memory_space<vmem>>) attributes {dimension_semantics = [#tpu.dimension_semantics<parallel>], iteration_bounds = array<i64: 1>, scalar_prefetch = 0 : i64, scratch_operands = 0 : i64, tpu.core_type = #tpu.core_type<tc>, window_params = [{transform_indices = @transform_0, window_bounds = array<i64: 30, 8, 128>}, {transform_indices = @transform_1, window_bounds = array<i64: 32, 8, 128>}, {transform_indices = @transform_2, window_bounds = array<i64: 8, 128>}, {transform_indices = @transform_3, window_bounds = array<i64: 8, 128>}, {transform_indices = @transform_4, window_bounds = array<i64: 1, 64, 128>}]} {
    %0 = tpu.iota {dimensions = array<i32: 0>} : vector<8x128xi32>
    %1 = tpu.iota {dimensions = array<i32: 1>} : vector<8x128xi32>
    %c128_i32 = arith.constant 128 : i32
    %2 = vector.broadcast %c128_i32 : i32 to vector<8x128xi32>
    %3 = arith.muli %0, %2 : vector<8x128xi32>
    %4 = arith.addi %3, %1 : vector<8x128xi32>
    %c8_i32 = arith.constant 8 : i32
    %5 = arith.muli %arg0, %c8_i32 : i32
    %c128_i32_0 = arith.constant 128 : i32
    %6 = arith.muli %5, %c128_i32_0 : i32
    %cst = arith.constant 0.000000e+00 : f32
    %7 = vector.broadcast %cst : f32 to vector<8x128xf32>
    %c0_i32 = arith.constant 0 : i32
    %c8_i32_1 = arith.constant 8 : i32
    %8 = arith.muli %c0_i32, %c8_i32_1 : i32
    %9 = tpu.assume_multiple %8, 8 : i32
    %10 = arith.index_cast %9 : i32 to index
    %c0 = arith.constant 0 : index
    %11 = vector.load %arg3[%10, %c0] : memref<8x128xf32, #tpu.memory_space<vmem>>, vector<8x128xf32>
    %c128_i32_2 = arith.constant 128 : i32
    %12 = arith.muli %9, %c128_i32_2 : i32
    %13 = arith.addi %6, %12 : i32
    %14 = vector.broadcast %13 : i32 to vector<8x128xi32>
    %15 = arith.addi %14, %4 : vector<8x128xi32>
    %c98_i32 = arith.constant 98 : i32
    %16 = vector.broadcast %c98_i32 : i32 to vector<8x128xi32>
    %17 = arith.cmpi slt, %15, %16 : vector<8x128xi32>
    %18 = arith.extui %17 : vector<8x128xi1> to vector<8x128xi32>
    %19 = arith.sitofp %18 : vector<8x128xi32> to vector<8x128xf32>
    %20 = arith.subf %19, %11 : vector<8x128xf32>
    %c30 = arith.constant 30 : index
    %21 = arith.index_cast %9 : i32 to index
    %c0_3 = arith.constant 0 : index
    %22 = vector.load %arg2[%c30, %21, %c0_3] : memref<32x8x128xf32, #tpu.memory_space<vmem>>, vector<1x8x128xf32>
    %23 = vector.shape_cast %22 : vector<1x8x128xf32> to vector<8x128xf32>
    %c31 = arith.constant 31 : index
    %24 = arith.index_cast %9 : i32 to index
    %c0_4 = arith.constant 0 : index
    %25 = vector.load %arg2[%c31, %24, %c0_4] : memref<32x8x128xf32, #tpu.memory_space<vmem>>, vector<1x8x128xf32>
    %26 = vector.shape_cast %25 : vector<1x8x128xf32> to vector<8x128xf32>
    %c5 = arith.constant 5 : index
    %27 = arith.index_cast %9 : i32 to index
    %c0_5 = arith.constant 0 : index
    %28 = vector.load %arg2[%c5, %27, %c0_5] : memref<32x8x128xf32, #tpu.memory_space<vmem>>, vector<1x8x128xf32>
    %29 = vector.shape_cast %28 : vector<1x8x128xf32> to vector<8x128xf32>
    %c6 = arith.constant 6 : index
    %30 = arith.index_cast %9 : i32 to index
    %c0_6 = arith.constant 0 : index
    %31 = vector.load %arg2[%c6, %30, %c0_6] : memref<32x8x128xf32, #tpu.memory_space<vmem>>, vector<1x8x128xf32>
    %32 = vector.shape_cast %31 : vector<1x8x128xf32> to vector<8x128xf32>
    %c7 = arith.constant 7 : index
    %33 = arith.index_cast %9 : i32 to index
    %c0_7 = arith.constant 0 : index
    %34 = vector.load %arg2[%c7, %33, %c0_7] : memref<32x8x128xf32, #tpu.memory_space<vmem>>, vector<1x8x128xf32>
    %35 = vector.shape_cast %34 : vector<1x8x128xf32> to vector<8x128xf32>
    %c8 = arith.constant 8 : index
    %36 = arith.index_cast %9 : i32 to index
    %c0_8 = arith.constant 0 : index
    %37 = vector.load %arg2[%c8, %36, %c0_8] : memref<32x8x128xf32, #tpu.memory_space<vmem>>, vector<1x8x128xf32>
    %38 = vector.shape_cast %37 : vector<1x8x128xf32> to vector<8x128xf32>
    %c9 = arith.constant 9 : index
    %39 = arith.index_cast %9 : i32 to index
    %c0_9 = arith.constant 0 : index
    %40 = vector.load %arg2[%c9, %39, %c0_9] : memref<32x8x128xf32, #tpu.memory_space<vmem>>, vector<1x8x128xf32>
    %41 = vector.shape_cast %40 : vector<1x8x128xf32> to vector<8x128xf32>
    %c0_10 = arith.constant 0 : index
    %42 = arith.index_cast %9 : i32 to index
    %c0_11 = arith.constant 0 : index
    %43 = vector.load %arg1[%c0_10, %42, %c0_11] : memref<30x8x128xf32, #tpu.memory_space<vmem>>, vector<1x8x128xf32>
    %44 = vector.shape_cast %43 : vector<1x8x128xf32> to vector<8x128xf32>
    %c1 = arith.constant 1 : index
    %45 = arith.index_cast %9 : i32 to index
    %c0_12 = arith.constant 0 : index
    %46 = vector.load %arg1[%c1, %45, %c0_12] : memref<30x8x128xf32, #tpu.memory_space<vmem>>, vector<1x8x128xf32>
    %47 = vector.shape_cast %46 : vector<1x8x128xf32> to vector<8x128xf32>
    %c2 = arith.constant 2 : index
    %48 = arith.index_cast %9 : i32 to index
    %c0_13 = arith.constant 0 : index
    %49 = vector.load %arg1[%c2, %48, %c0_13] : memref<30x8x128xf32, #tpu.memory_space<vmem>>, vector<1x8x128xf32>
    %50 = vector.shape_cast %49 : vector<1x8x128xf32> to vector<8x128xf32>
    %c3 = arith.constant 3 : index
    %51 = arith.index_cast %9 : i32 to index
    %c0_14 = arith.constant 0 : index
    %52 = vector.load %arg1[%c3, %51, %c0_14] : memref<30x8x128xf32, #tpu.memory_space<vmem>>, vector<1x8x128xf32>
    %53 = vector.shape_cast %52 : vector<1x8x128xf32> to vector<8x128xf32>
    %c4 = arith.constant 4 : index
    %54 = arith.index_cast %9 : i32 to index
    %c0_15 = arith.constant 0 : index
    %55 = vector.load %arg1[%c4, %54, %c0_15] : memref<30x8x128xf32, #tpu.memory_space<vmem>>, vector<1x8x128xf32>
    %56 = vector.shape_cast %55 : vector<1x8x128xf32> to vector<8x128xf32>
    %57 = arith.addf %44, %23 : vector<8x128xf32>
    %cst_16 = arith.constant 6.400000e+01 : f32
    %58 = vector.broadcast %cst_16 : f32 to vector<8x128xf32>
    %59 = arith.mulf %57, %58 : vector<8x128xf32>
    %60 = arith.addf %47, %26 : vector<8x128xf32>
    %cst_17 = arith.constant 6.400000e+01 : f32
    %61 = vector.broadcast %cst_17 : f32 to vector<8x128xf32>
    %62 = arith.mulf %60, %61 : vector<8x128xf32>
    %cst_18 = arith.constant 4.480000e+02 : f32
    %63 = vector.broadcast %cst_18 : f32 to vector<8x128xf32>
    %64 = arith.mulf %50, %63 : vector<8x128xf32>
    %cst_19 = arith.constant 4.480000e+02 : f32
    %65 = vector.broadcast %cst_19 : f32 to vector<8x128xf32>
    %66 = arith.mulf %53, %65 : vector<8x128xf32>
    %cst_20 = arith.constant 5.000000e-01 : f32
    %67 = vector.broadcast %cst_20 : f32 to vector<8x128xf32>
    %68 = arith.mulf %64, %67 : vector<8x128xf32>
    %cst_21 = arith.constant 5.000000e-01 : f32
    %69 = vector.broadcast %cst_21 : f32 to vector<8x128xf32>
    %70 = arith.mulf %66, %69 : vector<8x128xf32>
    %71 = arith.subf %59, %68 : vector<8x128xf32>
    %cst_22 = arith.constant 0.000000e+00 : f32
    %72 = vector.broadcast %cst_22 : f32 to vector<8x128xf32>
    %73 = arith.maximumf %72, %71 : vector<8x128xf32>
    %74 = arith.subf %62, %70 : vector<8x128xf32>
    %cst_23 = arith.constant 0.000000e+00 : f32
    %75 = vector.broadcast %cst_23 : f32 to vector<8x128xf32>
    %76 = arith.maximumf %75, %74 : vector<8x128xf32>
    %77 = arith.addf %59, %68 : vector<8x128xf32>
    %cst_24 = arith.constant 4.470000e+02 : f32
    %78 = vector.broadcast %cst_24 : f32 to vector<8x128xf32>
    %79 = arith.minimumf %78, %77 : vector<8x128xf32>
    %80 = arith.addf %62, %70 : vector<8x128xf32>
    %cst_25 = arith.constant 4.470000e+02 : f32
    %81 = vector.broadcast %cst_25 : f32 to vector<8x128xf32>
    %82 = arith.minimumf %81, %80 : vector<8x128xf32>
    %83 = arith.mulf %64, %66 : vector<8x128xf32>
    %84 = arith.maximumf %73, %29 : vector<8x128xf32>
    %85 = arith.maximumf %76, %32 : vector<8x128xf32>
    %86 = arith.minimumf %79, %35 : vector<8x128xf32>
    %87 = arith.minimumf %82, %38 : vector<8x128xf32>
    %88 = arith.cmpf olt, %84, %86 : vector<8x128xf32>
    %89 = arith.cmpf olt, %85, %87 : vector<8x128xf32>
    %90 = arith.andi %88, %89 : vector<8x128xi1>
    %91 = arith.subf %86, %84 : vector<8x128xf32>
    %92 = arith.subf %87, %85 : vector<8x128xf32>
    %93 = arith.mulf %91, %92 : vector<8x128xf32>
    %cst_26 = arith.constant 0.000000e+00 : f32
    %94 = vector.broadcast %cst_26 : f32 to vector<8x128xf32>
    %95 = arith.select %90, %93, %94 : vector<8x128xi1>, vector<8x128xf32>
    %96 = arith.addf %83, %41 : vector<8x128xf32>
    %97 = arith.subf %96, %95 : vector<8x128xf32>
    %c5_27 = arith.constant 5 : index
    %98 = arith.index_cast %9 : i32 to index
    %c0_28 = arith.constant 0 : index
    %99 = vector.load %arg1[%c5_27, %98, %c0_28] : memref<30x8x128xf32, #tpu.memory_space<vmem>>, vector<1x8x128xf32>
    %100 = vector.shape_cast %99 : vector<1x8x128xf32> to vector<8x128xf32>
    %c6_29 = arith.constant 6 : index
    %101 = arith.index_cast %9 : i32 to index
    %c0_30 = arith.constant 0 : index
    %102 = vector.load %arg1[%c6_29, %101, %c0_30] : memref<30x8x128xf32, #tpu.memory_space<vmem>>, vector<1x8x128xf32>
    %103 = vector.shape_cast %102 : vector<1x8x128xf32> to vector<8x128xf32>
    %c7_31 = arith.constant 7 : index
    %104 = arith.index_cast %9 : i32 to index
    %c0_32 = arith.constant 0 : index
    %105 = vector.load %arg1[%c7_31, %104, %c0_32] : memref<30x8x128xf32, #tpu.memory_space<vmem>>, vector<1x8x128xf32>
    %106 = vector.shape_cast %105 : vector<1x8x128xf32> to vector<8x128xf32>
    %c8_33 = arith.constant 8 : index
    %107 = arith.index_cast %9 : i32 to index
    %c0_34 = arith.constant 0 : index
    %108 = vector.load %arg1[%c8_33, %107, %c0_34] : memref<30x8x128xf32, #tpu.memory_space<vmem>>, vector<1x8x128xf32>
    %109 = vector.shape_cast %108 : vector<1x8x128xf32> to vector<8x128xf32>
    %c9_35 = arith.constant 9 : index
    %110 = arith.index_cast %9 : i32 to index
    %c0_36 = arith.constant 0 : index
    %111 = vector.load %arg1[%c9_35, %110, %c0_36] : memref<30x8x128xf32, #tpu.memory_space<vmem>>, vector<1x8x128xf32>
    %112 = vector.shape_cast %111 : vector<1x8x128xf32> to vector<8x128xf32>
    %113 = arith.addf %100, %23 : vector<8x128xf32>
    %cst_37 = arith.constant 6.400000e+01 : f32
    %114 = vector.broadcast %cst_37 : f32 to vector<8x128xf32>
    %115 = arith.mulf %113, %114 : vector<8x128xf32>
    %116 = arith.addf %103, %26 : vector<8x128xf32>
    %cst_38 = arith.constant 6.400000e+01 : f32
    %117 = vector.broadcast %cst_38 : f32 to vector<8x128xf32>
    %118 = arith.mulf %116, %117 : vector<8x128xf32>
    %cst_39 = arith.constant 4.480000e+02 : f32
    %119 = vector.broadcast %cst_39 : f32 to vector<8x128xf32>
    %120 = arith.mulf %106, %119 : vector<8x128xf32>
    %cst_40 = arith.constant 4.480000e+02 : f32
    %121 = vector.broadcast %cst_40 : f32 to vector<8x128xf32>
    %122 = arith.mulf %109, %121 : vector<8x128xf32>
    %cst_41 = arith.constant 5.000000e-01 : f32
    %123 = vector.broadcast %cst_41 : f32 to vector<8x128xf32>
    %124 = arith.mulf %120, %123 : vector<8x128xf32>
    %cst_42 = arith.constant 5.000000e-01 : f32
    %125 = vector.broadcast %cst_42 : f32 to vector<8x128xf32>
    %126 = arith.mulf %122, %125 : vector<8x128xf32>
    %127 = arith.subf %115, %124 : vector<8x128xf32>
    %cst_43 = arith.constant 0.000000e+00 : f32
    %128 = vector.broadcast %cst_43 : f32 to vector<8x128xf32>
    %129 = arith.maximumf %128, %127 : vector<8x128xf32>
    %130 = arith.subf %118, %126 : vector<8x128xf32>
    %cst_44 = arith.constant 0.000000e+00 : f32
    %131 = vector.broadcast %cst_44 : f32 to vector<8x128xf32>
    %132 = arith.maximumf %131, %130 : vector<8x128xf32>
    %133 = arith.addf %115, %124 : vector<8x128xf32>
    %cst_45 = arith.constant 4.470000e+02 : f32
    %134 = vector.broadcast %cst_45 : f32 to vector<8x128xf32>
    %135 = arith.minimumf %134, %133 : vector<8x128xf32>
    %136 = arith.addf %118, %126 : vector<8x128xf32>
    %cst_46 = arith.constant 4.470000e+02 : f32
    %137 = vector.broadcast %cst_46 : f32 to vector<8x128xf32>
    %138 = arith.minimumf %137, %136 : vector<8x128xf32>
    %139 = arith.mulf %120, %122 : vector<8x128xf32>
    %140 = arith.maximumf %129, %29 : vector<8x128xf32>
    %141 = arith.maximumf %132, %32 : vector<8x128xf32>
    %142 = arith.minimumf %135, %35 : vector<8x128xf32>
    %143 = arith.minimumf %138, %38 : vector<8x128xf32>
    %144 = arith.cmpf olt, %140, %142 : vector<8x128xf32>
    %145 = arith.cmpf olt, %141, %143 : vector<8x128xf32>
    %146 = arith.andi %144, %145 : vector<8x128xi1>
    %147 = arith.subf %142, %140 : vector<8x128xf32>
    %148 = arith.subf %143, %141 : vector<8x128xf32>
    %149 = arith.mulf %147, %148 : vector<8x128xf32>
    %cst_47 = arith.constant 0.000000e+00 : f32
    %150 = vector.broadcast %cst_47 : f32 to vector<8x128xf32>
    %151 = arith.select %146, %149, %150 : vector<8x128xi1>, vector<8x128xf32>
    %152 = arith.addf %139, %41 : vector<8x128xf32>
    %153 = arith.subf %152, %151 : vector<8x128xf32>
    %154 = arith.mulf %95, %153 : vector<8x128xf32>
    %155 = arith.mulf %151, %97 : vector<8x128xf32>
    %156 = arith.cmpf ogt, %154, %155 : vector<8x128xf32>
    %157 = arith.select %156, %95, %151 : vector<8x128xi1>, vector<8x128xf32>
    %158 = arith.select %156, %97, %153 : vector<8x128xi1>, vector<8x128xf32>
    %cst_48 = arith.constant 0.000000e+00 : f32
    %159 = vector.broadcast %cst_48 : f32 to vector<8x128xf32>
    %160 = arith.cmpf one, %158, %159 : vector<8x128xf32>
    %161 = arith.divf %157, %158 : vector<8x128xf32>
    %cst_49 = arith.constant 0.000000e+00 : f32
    %162 = vector.broadcast %cst_49 : f32 to vector<8x128xf32>
    %163 = arith.select %160, %161, %162 : vector<8x128xi1>, vector<8x128xf32>
    %164 = arith.select %156, %44, %100 : vector<8x128xi1>, vector<8x128xf32>
    %165 = arith.select %156, %47, %103 : vector<8x128xi1>, vector<8x128xf32>
    %166 = arith.select %156, %50, %106 : vector<8x128xi1>, vector<8x128xf32>
    %167 = arith.select %156, %53, %109 : vector<8x128xi1>, vector<8x128xf32>
    %168 = arith.select %156, %56, %112 : vector<8x128xi1>, vector<8x128xf32>
    %169 = arith.select %156, %112, %56 : vector<8x128xi1>, vector<8x128xf32>
    %c0_50 = arith.constant 0 : index
    %170 = arith.index_cast %9 : i32 to index
    %c0_51 = arith.constant 0 : index
    %171 = vector.load %arg2[%c0_50, %170, %c0_51] : memref<32x8x128xf32, #tpu.memory_space<vmem>>, vector<1x8x128xf32>
    %172 = vector.shape_cast %171 : vector<1x8x128xf32> to vector<8x128xf32>
    %c1_52 = arith.constant 1 : index
    %173 = arith.index_cast %9 : i32 to index
    %c0_53 = arith.constant 0 : index
    %174 = vector.load %arg2[%c1_52, %173, %c0_53] : memref<32x8x128xf32, #tpu.memory_space<vmem>>, vector<1x8x128xf32>
    %175 = vector.shape_cast %174 : vector<1x8x128xf32> to vector<8x128xf32>
    %c2_54 = arith.constant 2 : index
    %176 = arith.index_cast %9 : i32 to index
    %c0_55 = arith.constant 0 : index
    %177 = vector.load %arg2[%c2_54, %176, %c0_55] : memref<32x8x128xf32, #tpu.memory_space<vmem>>, vector<1x8x128xf32>
    %178 = vector.shape_cast %177 : vector<1x8x128xf32> to vector<8x128xf32>
    %c3_56 = arith.constant 3 : index
    %179 = arith.index_cast %9 : i32 to index
    %c0_57 = arith.constant 0 : index
    %180 = vector.load %arg2[%c3_56, %179, %c0_57] : memref<32x8x128xf32, #tpu.memory_space<vmem>>, vector<1x8x128xf32>
    %181 = vector.shape_cast %180 : vector<1x8x128xf32> to vector<8x128xf32>
    %182 = arith.subf %164, %172 : vector<8x128xf32>
    %183 = arith.mulf %182, %182 : vector<8x128xf32>
    %184 = arith.subf %165, %175 : vector<8x128xf32>
    %185 = arith.mulf %184, %184 : vector<8x128xf32>
    %186 = arith.addf %183, %185 : vector<8x128xf32>
    %cst_58 = arith.constant 9.99999993E-9 : f32
    %187 = vector.broadcast %cst_58 : f32 to vector<8x128xf32>
    %188 = arith.addf %166, %187 : vector<8x128xf32>
    %189 = math.sqrt %188 : vector<8x128xf32>
    %cst_59 = arith.constant 9.99999993E-9 : f32
    %190 = vector.broadcast %cst_59 : f32 to vector<8x128xf32>
    %191 = arith.addf %178, %190 : vector<8x128xf32>
    %192 = math.sqrt %191 : vector<8x128xf32>
    %193 = arith.subf %189, %192 : vector<8x128xf32>
    %194 = arith.mulf %193, %193 : vector<8x128xf32>
    %195 = arith.addf %186, %194 : vector<8x128xf32>
    %cst_60 = arith.constant 9.99999993E-9 : f32
    %196 = vector.broadcast %cst_60 : f32 to vector<8x128xf32>
    %197 = arith.addf %167, %196 : vector<8x128xf32>
    %198 = math.sqrt %197 : vector<8x128xf32>
    %cst_61 = arith.constant 9.99999993E-9 : f32
    %199 = vector.broadcast %cst_61 : f32 to vector<8x128xf32>
    %200 = arith.addf %181, %199 : vector<8x128xf32>
    %201 = math.sqrt %200 : vector<8x128xf32>
    %202 = arith.subf %198, %201 : vector<8x128xf32>
    %203 = arith.mulf %202, %202 : vector<8x128xf32>
    %204 = arith.addf %195, %203 : vector<8x128xf32>
    %cst_62 = arith.constant 1.000000e+00 : f32
    %205 = vector.broadcast %cst_62 : f32 to vector<8x128xf32>
    %206 = arith.subf %168, %205 : vector<8x128xf32>
    %207 = arith.mulf %206, %206 : vector<8x128xf32>
    %208 = arith.mulf %169, %169 : vector<8x128xf32>
    %209 = arith.mulf %208, %11 : vector<8x128xf32>
    %210 = arith.mulf %56, %56 : vector<8x128xf32>
    %211 = arith.mulf %112, %112 : vector<8x128xf32>
    %212 = arith.addf %210, %211 : vector<8x128xf32>
    %213 = arith.mulf %212, %20 : vector<8x128xf32>
    %214 = arith.addf %209, %213 : vector<8x128xf32>
    %215 = arith.index_cast %9 : i32 to index
    %c0_63 = arith.constant 0 : index
    %216 = vector.load %arg4[%215, %c0_63] : memref<8x128xf32, #tpu.memory_space<vmem>>, vector<8x128xf32>
    %cst_64 = arith.constant 0.000000e+00 : f32
    %217 = vector.broadcast %cst_64 : f32 to vector<8x128xf32>
    %cst_65 = arith.constant 0.000000e+00 : f32
    %218 = vector.broadcast %cst_65 : f32 to vector<8x128xf32>
    %c10 = arith.constant 10 : index
    %219 = arith.index_cast %9 : i32 to index
    %c0_66 = arith.constant 0 : index
    %220 = vector.load %arg1[%c10, %219, %c0_66] : memref<30x8x128xf32, #tpu.memory_space<vmem>>, vector<1x8x128xf32>
    %221 = vector.shape_cast %220 : vector<1x8x128xf32> to vector<8x128xf32>
    %c10_67 = arith.constant 10 : index
    %222 = arith.index_cast %9 : i32 to index
    %c0_68 = arith.constant 0 : index
    %223 = vector.load %arg2[%c10_67, %222, %c0_68] : memref<32x8x128xf32, #tpu.memory_space<vmem>>, vector<1x8x128xf32>
    %224 = vector.shape_cast %223 : vector<1x8x128xf32> to vector<8x128xf32>
    %225 = arith.subf %221, %224 : vector<8x128xf32>
    %226 = arith.mulf %225, %225 : vector<8x128xf32>
    %227 = arith.addf %217, %226 : vector<8x128xf32>
    %228 = arith.cmpf ogt, %221, %216 : vector<8x128xf32>
    %229 = arith.extui %228 : vector<8x128xi1> to vector<8x128xi32>
    %230 = arith.sitofp %229 : vector<8x128xi32> to vector<8x128xf32>
    %231 = arith.addf %218, %230 : vector<8x128xf32>
    %c11 = arith.constant 11 : index
    %232 = arith.index_cast %9 : i32 to index
    %c0_69 = arith.constant 0 : index
    %233 = vector.load %arg1[%c11, %232, %c0_69] : memref<30x8x128xf32, #tpu.memory_space<vmem>>, vector<1x8x128xf32>
    %234 = vector.shape_cast %233 : vector<1x8x128xf32> to vector<8x128xf32>
    %c11_70 = arith.constant 11 : index
    %235 = arith.index_cast %9 : i32 to index
    %c0_71 = arith.constant 0 : index
    %236 = vector.load %arg2[%c11_70, %235, %c0_71] : memref<32x8x128xf32, #tpu.memory_space<vmem>>, vector<1x8x128xf32>
    %237 = vector.shape_cast %236 : vector<1x8x128xf32> to vector<8x128xf32>
    %238 = arith.subf %234, %237 : vector<8x128xf32>
    %239 = arith.mulf %238, %238 : vector<8x128xf32>
    %240 = arith.addf %227, %239 : vector<8x128xf32>
    %241 = arith.cmpf ogt, %234, %216 : vector<8x128xf32>
    %242 = arith.extui %241 : vector<8x128xi1> to vector<8x128xi32>
    %243 = arith.sitofp %242 : vector<8x128xi32> to vector<8x128xf32>
    %244 = arith.addf %231, %243 : vector<8x128xf32>
    %c12 = arith.constant 12 : index
    %245 = arith.index_cast %9 : i32 to index
    %c0_72 = arith.constant 0 : index
    %246 = vector.load %arg1[%c12, %245, %c0_72] : memref<30x8x128xf32, #tpu.memory_space<vmem>>, vector<1x8x128xf32>
    %247 = vector.shape_cast %246 : vector<1x8x128xf32> to vector<8x128xf32>
    %c12_73 = arith.constant 12 : index
    %248 = arith.index_cast %9 : i32 to index
    %c0_74 = arith.constant 0 : index
    %249 = vector.load %arg2[%c12_73, %248, %c0_74] : memref<32x8x128xf32, #tpu.memory_space<vmem>>, vector<1x8x128xf32>
    %250 = vector.shape_cast %249 : vector<1x8x128xf32> to vector<8x128xf32>
    %251 = arith.subf %247, %250 : vector<8x128xf32>
    %252 = arith.mulf %251, %251 : vector<8x128xf32>
    %253 = arith.addf %240, %252 : vector<8x128xf32>
    %254 = arith.cmpf ogt, %247, %216 : vector<8x128xf32>
    %255 = arith.extui %254 : vector<8x128xi1> to vector<8x128xi32>
    %256 = arith.sitofp %255 : vector<8x128xi32> to vector<8x128xf32>
    %257 = arith.addf %244, %256 : vector<8x128xf32>
    %c13 = arith.constant 13 : index
    %258 = arith.index_cast %9 : i32 to index
    %c0_75 = arith.constant 0 : index
    %259 = vector.load %arg1[%c13, %258, %c0_75] : memref<30x8x128xf32, #tpu.memory_space<vmem>>, vector<1x8x128xf32>
    %260 = vector.shape_cast %259 : vector<1x8x128xf32> to vector<8x128xf32>
    %c13_76 = arith.constant 13 : index
    %261 = arith.index_cast %9 : i32 to index
    %c0_77 = arith.constant 0 : index
    %262 = vector.load %arg2[%c13_76, %261, %c0_77] : memref<32x8x128xf32, #tpu.memory_space<vmem>>, vector<1x8x128xf32>
    %263 = vector.shape_cast %262 : vector<1x8x128xf32> to vector<8x128xf32>
    %264 = arith.subf %260, %263 : vector<8x128xf32>
    %265 = arith.mulf %264, %264 : vector<8x128xf32>
    %266 = arith.addf %253, %265 : vector<8x128xf32>
    %267 = arith.cmpf ogt, %260, %216 : vector<8x128xf32>
    %268 = arith.extui %267 : vector<8x128xi1> to vector<8x128xi32>
    %269 = arith.sitofp %268 : vector<8x128xi32> to vector<8x128xf32>
    %270 = arith.addf %257, %269 : vector<8x128xf32>
    %c14 = arith.constant 14 : index
    %271 = arith.index_cast %9 : i32 to index
    %c0_78 = arith.constant 0 : index
    %272 = vector.load %arg1[%c14, %271, %c0_78] : memref<30x8x128xf32, #tpu.memory_space<vmem>>, vector<1x8x128xf32>
    %273 = vector.shape_cast %272 : vector<1x8x128xf32> to vector<8x128xf32>
    %c14_79 = arith.constant 14 : index
    %274 = arith.index_cast %9 : i32 to index
    %c0_80 = arith.constant 0 : index
    %275 = vector.load %arg2[%c14_79, %274, %c0_80] : memref<32x8x128xf32, #tpu.memory_space<vmem>>, vector<1x8x128xf32>
    %276 = vector.shape_cast %275 : vector<1x8x128xf32> to vector<8x128xf32>
    %277 = arith.subf %273, %276 : vector<8x128xf32>
    %278 = arith.mulf %277, %277 : vector<8x128xf32>
    %279 = arith.addf %266, %278 : vector<8x128xf32>
    %280 = arith.cmpf ogt, %273, %216 : vector<8x128xf32>
    %281 = arith.extui %280 : vector<8x128xi1> to vector<8x128xi32>
    %282 = arith.sitofp %281 : vector<8x128xi32> to vector<8x128xf32>
    %283 = arith.addf %270, %282 : vector<8x128xf32>
    %c15 = arith.constant 15 : index
    %284 = arith.index_cast %9 : i32 to index
    %c0_81 = arith.constant 0 : index
    %285 = vector.load %arg1[%c15, %284, %c0_81] : memref<30x8x128xf32, #tpu.memory_space<vmem>>, vector<1x8x128xf32>
    %286 = vector.shape_cast %285 : vector<1x8x128xf32> to vector<8x128xf32>
    %c15_82 = arith.constant 15 : index
    %287 = arith.index_cast %9 : i32 to index
    %c0_83 = arith.constant 0 : index
    %288 = vector.load %arg2[%c15_82, %287, %c0_83] : memref<32x8x128xf32, #tpu.memory_space<vmem>>, vector<1x8x128xf32>
    %289 = vector.shape_cast %288 : vector<1x8x128xf32> to vector<8x128xf32>
    %290 = arith.subf %286, %289 : vector<8x128xf32>
    %291 = arith.mulf %290, %290 : vector<8x128xf32>
    %292 = arith.addf %279, %291 : vector<8x128xf32>
    %293 = arith.cmpf ogt, %286, %216 : vector<8x128xf32>
    %294 = arith.extui %293 : vector<8x128xi1> to vector<8x128xi32>
    %295 = arith.sitofp %294 : vector<8x128xi32> to vector<8x128xf32>
    %296 = arith.addf %283, %295 : vector<8x128xf32>
    %c16 = arith.constant 16 : index
    %297 = arith.index_cast %9 : i32 to index
    %c0_84 = arith.constant 0 : index
    %298 = vector.load %arg1[%c16, %297, %c0_84] : memref<30x8x128xf32, #tpu.memory_space<vmem>>, vector<1x8x128xf32>
    %299 = vector.shape_cast %298 : vector<1x8x128xf32> to vector<8x128xf32>
    %c16_85 = arith.constant 16 : index
    %300 = arith.index_cast %9 : i32 to index
    %c0_86 = arith.constant 0 : index
    %301 = vector.load %arg2[%c16_85, %300, %c0_86] : memref<32x8x128xf32, #tpu.memory_space<vmem>>, vector<1x8x128xf32>
    %302 = vector.shape_cast %301 : vector<1x8x128xf32> to vector<8x128xf32>
    %303 = arith.subf %299, %302 : vector<8x128xf32>
    %304 = arith.mulf %303, %303 : vector<8x128xf32>
    %305 = arith.addf %292, %304 : vector<8x128xf32>
    %306 = arith.cmpf ogt, %299, %216 : vector<8x128xf32>
    %307 = arith.extui %306 : vector<8x128xi1> to vector<8x128xi32>
    %308 = arith.sitofp %307 : vector<8x128xi32> to vector<8x128xf32>
    %309 = arith.addf %296, %308 : vector<8x128xf32>
    %c17 = arith.constant 17 : index
    %310 = arith.index_cast %9 : i32 to index
    %c0_87 = arith.constant 0 : index
    %311 = vector.load %arg1[%c17, %310, %c0_87] : memref<30x8x128xf32, #tpu.memory_space<vmem>>, vector<1x8x128xf32>
    %312 = vector.shape_cast %311 : vector<1x8x128xf32> to vector<8x128xf32>
    %c17_88 = arith.constant 17 : index
    %313 = arith.index_cast %9 : i32 to index
    %c0_89 = arith.constant 0 : index
    %314 = vector.load %arg2[%c17_88, %313, %c0_89] : memref<32x8x128xf32, #tpu.memory_space<vmem>>, vector<1x8x128xf32>
    %315 = vector.shape_cast %314 : vector<1x8x128xf32> to vector<8x128xf32>
    %316 = arith.subf %312, %315 : vector<8x128xf32>
    %317 = arith.mulf %316, %316 : vector<8x128xf32>
    %318 = arith.addf %305, %317 : vector<8x128xf32>
    %319 = arith.cmpf ogt, %312, %216 : vector<8x128xf32>
    %320 = arith.extui %319 : vector<8x128xi1> to vector<8x128xi32>
    %321 = arith.sitofp %320 : vector<8x128xi32> to vector<8x128xf32>
    %322 = arith.addf %309, %321 : vector<8x128xf32>
    %c18 = arith.constant 18 : index
    %323 = arith.index_cast %9 : i32 to index
    %c0_90 = arith.constant 0 : index
    %324 = vector.load %arg1[%c18, %323, %c0_90] : memref<30x8x128xf32, #tpu.memory_space<vmem>>, vector<1x8x128xf32>
    %325 = vector.shape_cast %324 : vector<1x8x128xf32> to vector<8x128xf32>
    %c18_91 = arith.constant 18 : index
    %326 = arith.index_cast %9 : i32 to index
    %c0_92 = arith.constant 0 : index
    %327 = vector.load %arg2[%c18_91, %326, %c0_92] : memref<32x8x128xf32, #tpu.memory_space<vmem>>, vector<1x8x128xf32>
    %328 = vector.shape_cast %327 : vector<1x8x128xf32> to vector<8x128xf32>
    %329 = arith.subf %325, %328 : vector<8x128xf32>
    %330 = arith.mulf %329, %329 : vector<8x128xf32>
    %331 = arith.addf %318, %330 : vector<8x128xf32>
    %332 = arith.cmpf ogt, %325, %216 : vector<8x128xf32>
    %333 = arith.extui %332 : vector<8x128xi1> to vector<8x128xi32>
    %334 = arith.sitofp %333 : vector<8x128xi32> to vector<8x128xf32>
    %335 = arith.addf %322, %334 : vector<8x128xf32>
    %c19 = arith.constant 19 : index
    %336 = arith.index_cast %9 : i32 to index
    %c0_93 = arith.constant 0 : index
    %337 = vector.load %arg1[%c19, %336, %c0_93] : memref<30x8x128xf32, #tpu.memory_space<vmem>>, vector<1x8x128xf32>
    %338 = vector.shape_cast %337 : vector<1x8x128xf32> to vector<8x128xf32>
    %c19_94 = arith.constant 19 : index
    %339 = arith.index_cast %9 : i32 to index
    %c0_95 = arith.constant 0 : index
    %340 = vector.load %arg2[%c19_94, %339, %c0_95] : memref<32x8x128xf32, #tpu.memory_space<vmem>>, vector<1x8x128xf32>
    %341 = vector.shape_cast %340 : vector<1x8x128xf32> to vector<8x128xf32>
    %342 = arith.subf %338, %341 : vector<8x128xf32>
    %343 = arith.mulf %342, %342 : vector<8x128xf32>
    %344 = arith.addf %331, %343 : vector<8x128xf32>
    %345 = arith.cmpf ogt, %338, %216 : vector<8x128xf32>
    %346 = arith.extui %345 : vector<8x128xi1> to vector<8x128xi32>
    %347 = arith.sitofp %346 : vector<8x128xi32> to vector<8x128xf32>
    %348 = arith.addf %335, %347 : vector<8x128xf32>
    %c20 = arith.constant 20 : index
    %349 = arith.index_cast %9 : i32 to index
    %c0_96 = arith.constant 0 : index
    %350 = vector.load %arg1[%c20, %349, %c0_96] : memref<30x8x128xf32, #tpu.memory_space<vmem>>, vector<1x8x128xf32>
    %351 = vector.shape_cast %350 : vector<1x8x128xf32> to vector<8x128xf32>
    %c20_97 = arith.constant 20 : index
    %352 = arith.index_cast %9 : i32 to index
    %c0_98 = arith.constant 0 : index
    %353 = vector.load %arg2[%c20_97, %352, %c0_98] : memref<32x8x128xf32, #tpu.memory_space<vmem>>, vector<1x8x128xf32>
    %354 = vector.shape_cast %353 : vector<1x8x128xf32> to vector<8x128xf32>
    %355 = arith.subf %351, %354 : vector<8x128xf32>
    %356 = arith.mulf %355, %355 : vector<8x128xf32>
    %357 = arith.addf %344, %356 : vector<8x128xf32>
    %358 = arith.cmpf ogt, %351, %216 : vector<8x128xf32>
    %359 = arith.extui %358 : vector<8x128xi1> to vector<8x128xi32>
    %360 = arith.sitofp %359 : vector<8x128xi32> to vector<8x128xf32>
    %361 = arith.addf %348, %360 : vector<8x128xf32>
    %c21 = arith.constant 21 : index
    %362 = arith.index_cast %9 : i32 to index
    %c0_99 = arith.constant 0 : index
    %363 = vector.load %arg1[%c21, %362, %c0_99] : memref<30x8x128xf32, #tpu.memory_space<vmem>>, vector<1x8x128xf32>
    %364 = vector.shape_cast %363 : vector<1x8x128xf32> to vector<8x128xf32>
    %c21_100 = arith.constant 21 : index
    %365 = arith.index_cast %9 : i32 to index
    %c0_101 = arith.constant 0 : index
    %366 = vector.load %arg2[%c21_100, %365, %c0_101] : memref<32x8x128xf32, #tpu.memory_space<vmem>>, vector<1x8x128xf32>
    %367 = vector.shape_cast %366 : vector<1x8x128xf32> to vector<8x128xf32>
    %368 = arith.subf %364, %367 : vector<8x128xf32>
    %369 = arith.mulf %368, %368 : vector<8x128xf32>
    %370 = arith.addf %357, %369 : vector<8x128xf32>
    %371 = arith.cmpf ogt, %364, %216 : vector<8x128xf32>
    %372 = arith.extui %371 : vector<8x128xi1> to vector<8x128xi32>
    %373 = arith.sitofp %372 : vector<8x128xi32> to vector<8x128xf32>
    %374 = arith.addf %361, %373 : vector<8x128xf32>
    %c22 = arith.constant 22 : index
    %375 = arith.index_cast %9 : i32 to index
    %c0_102 = arith.constant 0 : index
    %376 = vector.load %arg1[%c22, %375, %c0_102] : memref<30x8x128xf32, #tpu.memory_space<vmem>>, vector<1x8x128xf32>
    %377 = vector.shape_cast %376 : vector<1x8x128xf32> to vector<8x128xf32>
    %c22_103 = arith.constant 22 : index
    %378 = arith.index_cast %9 : i32 to index
    %c0_104 = arith.constant 0 : index
    %379 = vector.load %arg2[%c22_103, %378, %c0_104] : memref<32x8x128xf32, #tpu.memory_space<vmem>>, vector<1x8x128xf32>
    %380 = vector.shape_cast %379 : vector<1x8x128xf32> to vector<8x128xf32>
    %381 = arith.subf %377, %380 : vector<8x128xf32>
    %382 = arith.mulf %381, %381 : vector<8x128xf32>
    %383 = arith.addf %370, %382 : vector<8x128xf32>
    %384 = arith.cmpf ogt, %377, %216 : vector<8x128xf32>
    %385 = arith.extui %384 : vector<8x128xi1> to vector<8x128xi32>
    %386 = arith.sitofp %385 : vector<8x128xi32> to vector<8x128xf32>
    %387 = arith.addf %374, %386 : vector<8x128xf32>
    %c23 = arith.constant 23 : index
    %388 = arith.index_cast %9 : i32 to index
    %c0_105 = arith.constant 0 : index
    %389 = vector.load %arg1[%c23, %388, %c0_105] : memref<30x8x128xf32, #tpu.memory_space<vmem>>, vector<1x8x128xf32>
    %390 = vector.shape_cast %389 : vector<1x8x128xf32> to vector<8x128xf32>
    %c23_106 = arith.constant 23 : index
    %391 = arith.index_cast %9 : i32 to index
    %c0_107 = arith.constant 0 : index
    %392 = vector.load %arg2[%c23_106, %391, %c0_107] : memref<32x8x128xf32, #tpu.memory_space<vmem>>, vector<1x8x128xf32>
    %393 = vector.shape_cast %392 : vector<1x8x128xf32> to vector<8x128xf32>
    %394 = arith.subf %390, %393 : vector<8x128xf32>
    %395 = arith.mulf %394, %394 : vector<8x128xf32>
    %396 = arith.addf %383, %395 : vector<8x128xf32>
    %397 = arith.cmpf ogt, %390, %216 : vector<8x128xf32>
    %398 = arith.extui %397 : vector<8x128xi1> to vector<8x128xi32>
    %399 = arith.sitofp %398 : vector<8x128xi32> to vector<8x128xf32>
    %400 = arith.addf %387, %399 : vector<8x128xf32>
    %c24 = arith.constant 24 : index
    %401 = arith.index_cast %9 : i32 to index
    %c0_108 = arith.constant 0 : index
    %402 = vector.load %arg1[%c24, %401, %c0_108] : memref<30x8x128xf32, #tpu.memory_space<vmem>>, vector<1x8x128xf32>
    %403 = vector.shape_cast %402 : vector<1x8x128xf32> to vector<8x128xf32>
    %c24_109 = arith.constant 24 : index
    %404 = arith.index_cast %9 : i32 to index
    %c0_110 = arith.constant 0 : index
    %405 = vector.load %arg2[%c24_109, %404, %c0_110] : memref<32x8x128xf32, #tpu.memory_space<vmem>>, vector<1x8x128xf32>
    %406 = vector.shape_cast %405 : vector<1x8x128xf32> to vector<8x128xf32>
    %407 = arith.subf %403, %406 : vector<8x128xf32>
    %408 = arith.mulf %407, %407 : vector<8x128xf32>
    %409 = arith.addf %396, %408 : vector<8x128xf32>
    %410 = arith.cmpf ogt, %403, %216 : vector<8x128xf32>
    %411 = arith.extui %410 : vector<8x128xi1> to vector<8x128xi32>
    %412 = arith.sitofp %411 : vector<8x128xi32> to vector<8x128xf32>
    %413 = arith.addf %400, %412 : vector<8x128xf32>
    %c25 = arith.constant 25 : index
    %414 = arith.index_cast %9 : i32 to index
    %c0_111 = arith.constant 0 : index
    %415 = vector.load %arg1[%c25, %414, %c0_111] : memref<30x8x128xf32, #tpu.memory_space<vmem>>, vector<1x8x128xf32>
    %416 = vector.shape_cast %415 : vector<1x8x128xf32> to vector<8x128xf32>
    %c25_112 = arith.constant 25 : index
    %417 = arith.index_cast %9 : i32 to index
    %c0_113 = arith.constant 0 : index
    %418 = vector.load %arg2[%c25_112, %417, %c0_113] : memref<32x8x128xf32, #tpu.memory_space<vmem>>, vector<1x8x128xf32>
    %419 = vector.shape_cast %418 : vector<1x8x128xf32> to vector<8x128xf32>
    %420 = arith.subf %416, %419 : vector<8x128xf32>
    %421 = arith.mulf %420, %420 : vector<8x128xf32>
    %422 = arith.addf %409, %421 : vector<8x128xf32>
    %423 = arith.cmpf ogt, %416, %216 : vector<8x128xf32>
    %424 = arith.extui %423 : vector<8x128xi1> to vector<8x128xi32>
    %425 = arith.sitofp %424 : vector<8x128xi32> to vector<8x128xf32>
    %426 = arith.addf %413, %425 : vector<8x128xf32>
    %c26 = arith.constant 26 : index
    %427 = arith.index_cast %9 : i32 to index
    %c0_114 = arith.constant 0 : index
    %428 = vector.load %arg1[%c26, %427, %c0_114] : memref<30x8x128xf32, #tpu.memory_space<vmem>>, vector<1x8x128xf32>
    %429 = vector.shape_cast %428 : vector<1x8x128xf32> to vector<8x128xf32>
    %c26_115 = arith.constant 26 : index
    %430 = arith.index_cast %9 : i32 to index
    %c0_116 = arith.constant 0 : index
    %431 = vector.load %arg2[%c26_115, %430, %c0_116] : memref<32x8x128xf32, #tpu.memory_space<vmem>>, vector<1x8x128xf32>
    %432 = vector.shape_cast %431 : vector<1x8x128xf32> to vector<8x128xf32>
    %433 = arith.subf %429, %432 : vector<8x128xf32>
    %434 = arith.mulf %433, %433 : vector<8x128xf32>
    %435 = arith.addf %422, %434 : vector<8x128xf32>
    %436 = arith.cmpf ogt, %429, %216 : vector<8x128xf32>
    %437 = arith.extui %436 : vector<8x128xi1> to vector<8x128xi32>
    %438 = arith.sitofp %437 : vector<8x128xi32> to vector<8x128xf32>
    %439 = arith.addf %426, %438 : vector<8x128xf32>
    %c27 = arith.constant 27 : index
    %440 = arith.index_cast %9 : i32 to index
    %c0_117 = arith.constant 0 : index
    %441 = vector.load %arg1[%c27, %440, %c0_117] : memref<30x8x128xf32, #tpu.memory_space<vmem>>, vector<1x8x128xf32>
    %442 = vector.shape_cast %441 : vector<1x8x128xf32> to vector<8x128xf32>
    %c27_118 = arith.constant 27 : index
    %443 = arith.index_cast %9 : i32 to index
    %c0_119 = arith.constant 0 : index
    %444 = vector.load %arg2[%c27_118, %443, %c0_119] : memref<32x8x128xf32, #tpu.memory_space<vmem>>, vector<1x8x128xf32>
    %445 = vector.shape_cast %444 : vector<1x8x128xf32> to vector<8x128xf32>
    %446 = arith.subf %442, %445 : vector<8x128xf32>
    %447 = arith.mulf %446, %446 : vector<8x128xf32>
    %448 = arith.addf %435, %447 : vector<8x128xf32>
    %449 = arith.cmpf ogt, %442, %216 : vector<8x128xf32>
    %450 = arith.extui %449 : vector<8x128xi1> to vector<8x128xi32>
    %451 = arith.sitofp %450 : vector<8x128xi32> to vector<8x128xf32>
    %452 = arith.addf %439, %451 : vector<8x128xf32>
    %c28 = arith.constant 28 : index
    %453 = arith.index_cast %9 : i32 to index
    %c0_120 = arith.constant 0 : index
    %454 = vector.load %arg1[%c28, %453, %c0_120] : memref<30x8x128xf32, #tpu.memory_space<vmem>>, vector<1x8x128xf32>
    %455 = vector.shape_cast %454 : vector<1x8x128xf32> to vector<8x128xf32>
    %c28_121 = arith.constant 28 : index
    %456 = arith.index_cast %9 : i32 to index
    %c0_122 = arith.constant 0 : index
    %457 = vector.load %arg2[%c28_121, %456, %c0_122] : memref<32x8x128xf32, #tpu.memory_space<vmem>>, vector<1x8x128xf32>
    %458 = vector.shape_cast %457 : vector<1x8x128xf32> to vector<8x128xf32>
    %459 = arith.subf %455, %458 : vector<8x128xf32>
    %460 = arith.mulf %459, %459 : vector<8x128xf32>
    %461 = arith.addf %448, %460 : vector<8x128xf32>
    %462 = arith.cmpf ogt, %455, %216 : vector<8x128xf32>
    %463 = arith.extui %462 : vector<8x128xi1> to vector<8x128xi32>
    %464 = arith.sitofp %463 : vector<8x128xi32> to vector<8x128xf32>
    %465 = arith.addf %452, %464 : vector<8x128xf32>
    %c29 = arith.constant 29 : index
    %466 = arith.index_cast %9 : i32 to index
    %c0_123 = arith.constant 0 : index
    %467 = vector.load %arg1[%c29, %466, %c0_123] : memref<30x8x128xf32, #tpu.memory_space<vmem>>, vector<1x8x128xf32>
    %468 = vector.shape_cast %467 : vector<1x8x128xf32> to vector<8x128xf32>
    %c29_124 = arith.constant 29 : index
    %469 = arith.index_cast %9 : i32 to index
    %c0_125 = arith.constant 0 : index
    %470 = vector.load %arg2[%c29_124, %469, %c0_125] : memref<32x8x128xf32, #tpu.memory_space<vmem>>, vector<1x8x128xf32>
    %471 = vector.shape_cast %470 : vector<1x8x128xf32> to vector<8x128xf32>
    %472 = arith.subf %468, %471 : vector<8x128xf32>
    %473 = arith.mulf %472, %472 : vector<8x128xf32>
    %474 = arith.addf %461, %473 : vector<8x128xf32>
    %475 = arith.cmpf ogt, %468, %216 : vector<8x128xf32>
    %476 = arith.extui %475 : vector<8x128xi1> to vector<8x128xi32>
    %477 = arith.sitofp %476 : vector<8x128xi32> to vector<8x128xf32>
    %478 = arith.addf %465, %477 : vector<8x128xf32>
    %cst_126 = arith.constant 1.000000e+00 : f32
    %479 = vector.broadcast %cst_126 : f32 to vector<8x128xf32>
    %480 = arith.cmpf olt, %478, %479 : vector<8x128xf32>
    %481 = arith.extui %480 : vector<8x128xi1> to vector<8x128xi32>
    %482 = arith.sitofp %481 : vector<8x128xi32> to vector<8x128xf32>
    %cst_127 = arith.constant 5.000000e+00 : f32
    %483 = vector.broadcast %cst_127 : f32 to vector<8x128xf32>
    %484 = arith.cmpf olt, %478, %483 : vector<8x128xf32>
    %485 = arith.extui %484 : vector<8x128xi1> to vector<8x128xi32>
    %486 = arith.sitofp %485 : vector<8x128xi32> to vector<8x128xf32>
    %487 = arith.mulf %204, %11 : vector<8x128xf32>
    %488 = arith.addf %7, %487 : vector<8x128xf32>
    %489 = arith.mulf %207, %11 : vector<8x128xf32>
    %490 = arith.addf %7, %489 : vector<8x128xf32>
    %491 = arith.addf %7, %214 : vector<8x128xf32>
    %492 = arith.mulf %474, %11 : vector<8x128xf32>
    %493 = arith.addf %7, %492 : vector<8x128xf32>
    %494 = arith.addf %7, %11 : vector<8x128xf32>
    %495 = arith.mulf %482, %11 : vector<8x128xf32>
    %496 = arith.addf %7, %495 : vector<8x128xf32>
    %497 = arith.mulf %486, %11 : vector<8x128xf32>
    %498 = arith.addf %7, %497 : vector<8x128xf32>
    %499 = arith.mulf %163, %11 : vector<8x128xf32>
    %500 = arith.addf %7, %499 : vector<8x128xf32>
    %c1_i32 = arith.constant 1 : i32
    %c0_128 = arith.constant 0 : index
    %c0_129 = arith.constant 0 : index
    %c0_130 = arith.constant 0 : index
    %501 = vector.load %arg5[%c0_128, %c0_129, %c0_130] : memref<1x64x128xf32, #tpu.memory_space<vmem>>, vector<1x8x128xf32>
    %502 = vector.shape_cast %501 : vector<1x8x128xf32> to vector<8x128xf32>
    %503 = vector.shape_cast %488 : vector<8x128xf32> to vector<1x8x128xf32>
    tpu.vector_store %arg5[%c0_128, %c0_129, %c0_130], %503 {strides = array<i32>} : memref<1x64x128xf32, #tpu.memory_space<vmem>>, vector<1x8x128xf32>,
    %c0_131 = arith.constant 0 : index
    %c8_132 = arith.constant 8 : index
    %c0_133 = arith.constant 0 : index
    %504 = vector.load %arg5[%c0_131, %c8_132, %c0_133] : memref<1x64x128xf32, #tpu.memory_space<vmem>>, vector<1x8x128xf32>
    %505 = vector.shape_cast %504 : vector<1x8x128xf32> to vector<8x128xf32>
    %506 = vector.shape_cast %490 : vector<8x128xf32> to vector<1x8x128xf32>
    tpu.vector_store %arg5[%c0_131, %c8_132, %c0_133], %506 {strides = array<i32>} : memref<1x64x128xf32, #tpu.memory_space<vmem>>, vector<1x8x128xf32>,
    %c0_134 = arith.constant 0 : index
    %c16_135 = arith.constant 16 : index
    %c0_136 = arith.constant 0 : index
    %507 = vector.load %arg5[%c0_134, %c16_135, %c0_136] : memref<1x64x128xf32, #tpu.memory_space<vmem>>, vector<1x8x128xf32>
    %508 = vector.shape_cast %507 : vector<1x8x128xf32> to vector<8x128xf32>
    %509 = vector.shape_cast %491 : vector<8x128xf32> to vector<1x8x128xf32>
    tpu.vector_store %arg5[%c0_134, %c16_135, %c0_136], %509 {strides = array<i32>} : memref<1x64x128xf32, #tpu.memory_space<vmem>>, vector<1x8x128xf32>,
    %c0_137 = arith.constant 0 : index
    %c24_138 = arith.constant 24 : index
    %c0_139 = arith.constant 0 : index
    %510 = vector.load %arg5[%c0_137, %c24_138, %c0_139] : memref<1x64x128xf32, #tpu.memory_space<vmem>>, vector<1x8x128xf32>
    %511 = vector.shape_cast %510 : vector<1x8x128xf32> to vector<8x128xf32>
    %512 = vector.shape_cast %493 : vector<8x128xf32> to vector<1x8x128xf32>
    tpu.vector_store %arg5[%c0_137, %c24_138, %c0_139], %512 {strides = array<i32>} : memref<1x64x128xf32, #tpu.memory_space<vmem>>, vector<1x8x128xf32>,
    %c0_140 = arith.constant 0 : index
    %c32 = arith.constant 32 : index
    %c0_141 = arith.constant 0 : index
    %513 = vector.load %arg5[%c0_140, %c32, %c0_141] : memref<1x64x128xf32, #tpu.memory_space<vmem>>, vector<1x8x128xf32>
    %514 = vector.shape_cast %513 : vector<1x8x128xf32> to vector<8x128xf32>
    %515 = vector.shape_cast %494 : vector<8x128xf32> to vector<1x8x128xf32>
    tpu.vector_store %arg5[%c0_140, %c32, %c0_141], %515 {strides = array<i32>} : memref<1x64x128xf32, #tpu.memory_space<vmem>>, vector<1x8x128xf32>,
    %c0_142 = arith.constant 0 : index
    %c40 = arith.constant 40 : index
    %c0_143 = arith.constant 0 : index
    %516 = vector.load %arg5[%c0_142, %c40, %c0_143] : memref<1x64x128xf32, #tpu.memory_space<vmem>>, vector<1x8x128xf32>
    %517 = vector.shape_cast %516 : vector<1x8x128xf32> to vector<8x128xf32>
    %518 = vector.shape_cast %496 : vector<8x128xf32> to vector<1x8x128xf32>
    tpu.vector_store %arg5[%c0_142, %c40, %c0_143], %518 {strides = array<i32>} : memref<1x64x128xf32, #tpu.memory_space<vmem>>, vector<1x8x128xf32>,
    %c0_144 = arith.constant 0 : index
    %c48 = arith.constant 48 : index
    %c0_145 = arith.constant 0 : index
    %519 = vector.load %arg5[%c0_144, %c48, %c0_145] : memref<1x64x128xf32, #tpu.memory_space<vmem>>, vector<1x8x128xf32>
    %520 = vector.shape_cast %519 : vector<1x8x128xf32> to vector<8x128xf32>
    %521 = vector.shape_cast %498 : vector<8x128xf32> to vector<1x8x128xf32>
    tpu.vector_store %arg5[%c0_144, %c48, %c0_145], %521 {strides = array<i32>} : memref<1x64x128xf32, #tpu.memory_space<vmem>>, vector<1x8x128xf32>,
    %c0_146 = arith.constant 0 : index
    %c56 = arith.constant 56 : index
    %c0_147 = arith.constant 0 : index
    %522 = vector.load %arg5[%c0_146, %c56, %c0_147] : memref<1x64x128xf32, #tpu.memory_space<vmem>>, vector<1x8x128xf32>
    %523 = vector.shape_cast %522 : vector<1x8x128xf32> to vector<8x128xf32>
    %524 = vector.shape_cast %500 : vector<8x128xf32> to vector<1x8x128xf32>
    tpu.vector_store %arg5[%c0_146, %c56, %c0_147], %524 {strides = array<i32>} : memref<1x64x128xf32, #tpu.memory_space<vmem>>, vector<1x8x128xf32>,
    return
  }
  func.func @transform_0(%arg0: i32) -> (i32, i32, i32) {
    %c0_i32 = arith.constant 0 : i32
    %c0_i32_0 = arith.constant 0 : i32
    %c0_i32_1 = arith.constant 0 : i32
    return %c0_i32, %arg0, %c0_i32_0 : i32, i32, i32
  }
  func.func @transform_1(%arg0: i32) -> (i32, i32, i32) {
    %c0_i32 = arith.constant 0 : i32
    %c0_i32_0 = arith.constant 0 : i32
    %c0_i32_1 = arith.constant 0 : i32
    return %c0_i32, %arg0, %c0_i32_0 : i32, i32, i32
  }
  func.func @transform_2(%arg0: i32) -> (i32, i32) {
    %c0_i32 = arith.constant 0 : i32
    %c0_i32_0 = arith.constant 0 : i32
    return %arg0, %c0_i32 : i32, i32
  }
  func.func @transform_3(%arg0: i32) -> (i32, i32) {
    %c0_i32 = arith.constant 0 : i32
    %c0_i32_0 = arith.constant 0 : i32
    return %arg0, %c0_i32 : i32, i32
  }
  func.func @transform_4(%arg0: i32) -> (i32, i32, i32) {
    %c0_i32 = arith.constant 0 : i32
    %c0_i32_0 = arith.constant 0 : i32
    %c0_i32_1 = arith.constant 0 : i32
    return %arg0, %c0_i32, %c0_i32_0 : i32, i32, i32
  }
}

</mosaic_0001>

<bundles_post_ra>
// kernel: yolo_loss.1
= control target key start
LH: loop header
LB: loop body
LE: loop exit
PB: predicated region body
PF: predicated region fallthrough
CT: control target
= control target key end

     0   :  { %v17_v0 = vlaneseq  ;;  %s1131_s0 = inlined_call_operand.vmem [shape: f32[30,8,128], index: 0, kind: input, shape index: {}]   ;;  %s1132_s1 = inlined_call_operand.vmem [shape: f32[32,8,128], index: 1, kind: input, shape index: {}]   ;;  %s1133_s2 = inlined_call_operand.vmem [shape: f32[8,128], index: 2, kind: input, shape index: {}]   ;;  %s1134_s4 = inlined_call_operand.vmem [shape: f32[1,64,128], index: 4, kind: output, shape index: {}]   ;;  %s1135_s3 = inlined_call_operand.vmem [shape: f32[8,128], index: 3, kind: input, shape index: {}]  }
   0x1   :  { %v666_v1 = vld [vmem:[%s1133_s2] sm:$0xff]  ;;  %v544_v2 = vld [vmem:[%s1132_s1 + $0xf0] sm:$0xff]  ;;  %v545_v3 = vld [vmem:[%s1132_s1 + $0xf8] sm:$0xff] }
   0x2   :  { %476 = vst [vmem:[%s1134_s4 + $0x20] sm:$0xff] %v666_v1  ;;  %v681_v4 = vld [vmem:[%s1131_s0] sm:$0xff]  ;;  %v683_v5 = vshrl.u32 %v17_v0, 7  ;;  %v688_v6 = vld [vmem:[%s1131_s0 + $0x8] sm:$0xff]  ;;  %v693_v7 = vld [vmem:[%s1131_s0 + $0x10] sm:$0xff]  ;;  %v20_v16 = vand.u32 127, %v17_v0 }
   0x3   :  { %v698_v8 = vld [vmem:[%s1131_s0 + $0x18] sm:$0xff]  ;;  %v67_v9 = vadd.f32 %v544_v2, %v681_v4  ;;  %v69_v10 = vadd.f32 %v688_v6, %v545_v3  ;;  %v71_v11 = vmul.f32 448.0, %v693_v7  ;;  %v707_v13 = vld [vmem:[%s1131_s0 + $0x28] sm:$0xff]  ;;  %v712_v14 = vld [vmem:[%s1131_s0 + $0x30] sm:$0xff] }
   0x4   :  { %v72_v12 = vmul.f32 448.0, %v698_v8  ;;  %v717_v15 = vld [vmem:[%s1131_s0 + $0x38] sm:$0xff]  ;;  %v722_v18 = vld [vmem:[%s1131_s0 + $0x40] sm:$0xff]  ;;  %v107_v19 = vadd.f32 %v707_v13, %v544_v2  ;;  %v109_v20 = vadd.f32 %v712_v14, %v545_v3  ;;  %v21_v25 = vmul.u32 128, %v683_v5  ;;  %v546_v30 = vld [vmem:[%s1132_s1 + $0x28] sm:$0xff] }
   0x5   :  { %v68_v17 = vmul.f32 64.0, %v67_v9  ;;  %v111_v21 = vmul.f32 448.0, %v717_v15  ;;  %v70_v22 = vmul.f32 64.0, %v69_v10  ;;  %v73_v23 = vmul.f32 0.5, %v71_v11  ;;  %v547_v35 = vld [vmem:[%s1132_s1 + $0x30] sm:$0xff]  ;;  %v548_v36 = vld [vmem:[%s1132_s1 + $0x38] sm:$0xff] }
   0x6   :  { %v74_v24 = vmul.f32 0.5, %v72_v12  ;;  %v108_v26 = vmul.f32 64.0, %v107_v19  ;;  %v110_v27 = vmul.f32 64.0, %v109_v20  ;;  %v112_v28 = vmul.f32 448.0, %v722_v18  ;;  %v549_v37 = vld [vmem:[%s1132_s1 + $0x40] sm:$0xff]  ;;  %v550_v50 = vld [vmem:[%s1132_s1 + $0x48] sm:$0xff] }
   0x7   :  { %v113_v29 = vmul.f32 0.5, %v111_v21  ;;  %v75_v31 = vsub.f32 %v68_v17, %v73_v23  ;;  %v79_v33 = vadd.f32 %v73_v23, %v68_v17  ;;  %v83_v38 = vmul.f32 %v72_v12, %v71_v11  ;;  %v561_v59 = vld [vmem:[%s1132_s1 + $0x10] sm:$0xff]  ;;  %v562_v60 = vld [vmem:[%s1132_s1 + $0x18] sm:$0xff] }
   0x8   :  { %v77_v32 = vsub.f32 %v70_v22, %v74_v24  ;;  %v81_v34 = vadd.f32 %v74_v24, %v70_v22  ;;  %v114_v39 = vmul.f32 0.5, %v112_v28  ;;  %v123_v57 = vmul.f32 %v112_v28, %v111_v21  ;;  %v763_v23 = vld [vmem:[%s1131_s0 + $0x50] sm:$0xff]  ;;  %v771_v24 = vld [vmem:[%s1131_s0 + $0x58] sm:$0xff] }
   0x9   :  { %v115_v40 = vsub.f32 %v108_v26, %v113_v29  ;;  %v119_v41 = vadd.f32 %v113_v29, %v108_v26  ;;  %v76_v42 = vmax.f32 %v75_v31, 0.0  ;;  %v80_v44 = vmin.f32 %v79_v33, 447.0  ;;  %v571_v33 = vld [vmem:[%s1132_s1 + $0x60] sm:$0xff] }
   0xa   :  { %v78_v43 = vmax.f32 %v77_v32, 0.0  ;;  %v82_v45 = vmin.f32 %v81_v34, 447.0  ;;  %v117_v47 = vsub.f32 %v110_v27, %v114_v39  ;;  %v121_v49 = vadd.f32 %v114_v39, %v110_v27  ;;  %v554_v27 = vld [vmem:[%s1131_s0 + $0x20] sm:$0xff]  ;;  %v574_v39 = vld [vmem:[%s1132_s1 + $0x68] sm:$0xff] }
   0xb   :  { %v116_v46 = vmax.f32 %v115_v40, 0.0  ;;  %v120_v48 = vmin.f32 %v119_v41, 447.0  ;;  %v84_v51 = vmax.f32 %v76_v42, %v546_v30  ;;  %v86_v53 = vmin.f32 %v80_v44, %v548_v36  ;;  %v794_v32 = vld [vmem:[%s1131_s0 + $0x60] sm:$0xff] }
   0xc   :  { %v85_v52 = vmax.f32 %v78_v43, %v547_v35  ;;  %v87_v54 = vmin.f32 %v82_v45, %v549_v37  ;;  %v118_v55 = vmax.f32 %v117_v47, 0.0  ;;  %v122_v56 = vmin.f32 %v121_v49, 447.0  ;;  %v816_v43 = vld [vmem:[%s1131_s0 + $0x70] sm:$0xff]  ;;  %v829_v49 = vld [vmem:[%s1131_s0 + $0x78] sm:$0xff] }
   0xd   :  { %v124_v58 = vmax.f32 %v116_v46, %v546_v30  ;;  %vm88_vm0 = vcmp.lt.f32.partialorder %v84_v51, %v86_v53  ;;  %v91_v61 = vsub.f32 %v86_v53, %v84_v51  ;;  %v95_v63 = vadd.f32 %v550_v50, %v83_v38  ;;  %v559_v30 = vld [vmem:[%s1131_s0 + $0x48] sm:$0xff] }
   0xe   :  { %vm89_vm1 = vcmp.lt.f32.partialorder %v85_v52, %v87_v54  ;;  %v92_v62 = vsub.f32 %v87_v54, %v85_v52  ;;  %v125_v0 = vmax.f32 %v118_v55, %v547_v35  ;;  %v126_v2 = vmin.f32 %v120_v48, %v548_v36  ;;  %v806_v38 = vld [vmem:[%s1131_s0 + $0x68] sm:$0xff]  ;;  %v577_v48 = vld [vmem:[%s1132_s1 + $0x70] sm:$0xff] }
   0xf   :  { %vm90_vm2 = vmand %vm88_vm0, %vm89_vm1  ;;  %v127_v3 = vmin.f32 %v122_v56, %v549_v37  ;;  %v750_v9 = vadd.f32 1e-08, %v561_v59  ;;  %v752_v10 = vadd.f32 1e-08, %v562_v60  ;;  %v22_v11 = vadd.s32 %v21_v25, %v20_v16  ;;  %v565_v16 = vld [vmem:[%s1132_s1 + $0x50] sm:$0xff]  ;;  %v568_v25 = vld [vmem:[%s1132_s1 + $0x58] sm:$0xff] }
  0x10   :  { %v93_v5 = vmul.f32 %v92_v62, %v91_v61  ;;  %vm128_vm3 = vcmp.lt.f32.partialorder %v124_v58, %v126_v2  ;;  %v131_v12 = vsub.f32 %v126_v2, %v124_v58  ;;  %v135_v20 = vadd.f32 %v550_v50, %v123_v57  ;;  %v580_v50 = vld [vmem:[%s1132_s1 + $0x78] sm:$0xff]  ;;  %v873_v61 = vld [vmem:[%s1131_s0 + $0x80] sm:$0xff] }
  0x11   :  { %vm129_vm4 = vcmp.lt.f32.partialorder %v125_v0, %v127_v3  ;;  %v132_v17 = vsub.f32 %v127_v3, %v125_v0  ;;  %627 = vrsqrt.f32 %v750_v9  ;;  %vm29_vm6 = vcmp.lt.s32.totalorder %v22_v11, 98  ;;  %v583_v62 = vld [vmem:[%s1132_s1 + $0x80] sm:$0xff] }
  0x12   :  { %v754_v19 = vsel %vm90_vm2, %v93_v5, 0.0  ;;  %vm130_vm5 = vmand %vm128_vm3, %vm129_vm4  ;;  %629 = vrsqrt.f32 %v752_v10  ;;  %v217_v31 = vsub.f32 %v763_v23, %v565_v16  ;;  %v229_v34 = vsub.f32 %v771_v24, %v568_v25  ;;  %v887_v16 = vld [vmem:[%s1131_s0 + $0x88] sm:$0xff] }
  0x13   :  { %v757_v21 = vsub.f32 %v95_v63, %v754_v19  ;;  %v133_v22 = vmul.f32 %v132_v17, %v131_v12  ;;  %v637_v36 = vmov 0.0   ;;  %vm175_vm7 = vcmp.eq.f32.partialorder %v750_v9, inf  ;;  %v586_v25 = vld [vmem:[%s1132_s1 + $0x88] sm:$0xff] }
  0x14   :  { %v543_v37 = vsel %vm29_vm6, 1.0, %v637_v36  ;;  %v206_v40 = vmul.f32 %v554_v27, %v554_v27  ;;  %v207_v41 = vmul.f32 %v559_v30, %v559_v30  ;;  %v241_v42 = vsub.f32 %v794_v32, %v571_v33  ;;  %v896_v33 = vld [vmem:[%s1131_s0 + $0x90] sm:$0xff] }
  0x15   :  { %v776_v26 = vsel %vm130_vm5, %v133_v22, 0.0  ;;  %v178_v45 = vand.u32 2147483648, %v750_v9  ;;  %v218_v46 = vmul.f32 %v217_v31, %v217_v31  ;;  %v230_v47 = vmul.f32 %v229_v34, %v229_v34 }
  0x16   :  { %v783_v28 = vsub.f32 %v135_v20, %v776_v26  ;;  %v138_v29 = vmul.f32 %v776_v26, %v757_v21  ;;  %v32_v53 = vsub.f32 %v543_v37, %v666_v1  ;;  %v253_v54 = vsub.f32 %v806_v38, %v574_v39 }
  0x17   :  { %vm177_vm9 = vcmp.eq.f32.partialorder %v750_v9, 0.0  ;;  %v242_v57 = vmul.f32 %v241_v42, %v241_v42  ;;  %v265_v58 = vsub.f32 %v816_v43, %v577_v48  ;;  %v231_v60 = vadd.f32 %v230_v47, %v218_v46  ;;  %v592_v42 = vld [vmem:[%s1132_s1 + $0x98] sm:$0xff] }
  0x18   :  { %v137_v35 = vmul.f32 %v783_v28, %v754_v19  ;;  %vm194_vm10 = vcmp.eq.f32.partialorder %v752_v10, inf  ;;  %vm196_vm11 = vcmp.eq.f32.partialorder %v752_v10, 0.0  ;;  %v197_v5 = vand.u32 2147483648, %v752_v10 }
  0x19   :  { %v254_v11 = vmul.f32 %v253_v54, %v253_v54  ;;  %v289_v22 = vsub.f32 %v873_v61, %v583_v62  ;;  %v301_v48 = vsub.f32 %v887_v16, %v586_v25 }
  0x1a   :  { %vm818_vm8 = vcmp.gt.f32.partialorder %v137_v35, %v138_v29  ;;  %v243_v29 = vadd.f32 %v242_v57, %v231_v60 }
  0x1b   :  { %v148_v51 = vsel %vm818_vm8, %v693_v7, %v717_v15  ;;  %v149_v52 = vsel %vm818_vm8, %v698_v8, %v722_v18  ;;  %v146_v55 = vsel %vm818_vm8, %v681_v4, %v707_v13  ;;  %v147_v56 = vsel %vm818_vm8, %v688_v6, %v712_v14  ;;  %v152_v7 = vld [vmem:[%s1132_s1] sm:$0xff]  ;;  %v560_v8 = vld [vmem:[%s1132_s1 + $0x8] sm:$0xff]  ;;  %v628_v4 = vpop.eup %627 }
  0x1c   :  { %v858_v15 = vadd.f32 1e-08, %v148_v51  ;;  %v861_v18 = vadd.f32 1e-08, %v149_v52  ;;  %v208_v13 = vadd.f32 %v207_v41, %v206_v40  ;;  %v277_v6 = vsub.f32 %v829_v49, %v580_v50  ;;  %v630_v63 = vpop.eup %629  ;;  %v589_v40 = vld [vmem:[%s1132_s1 + $0x90] sm:$0xff]  ;;  %v905_v41 = vld [vmem:[%s1131_s0 + $0x98] sm:$0xff] }
  0x1d   :  { %v150_v14 = vsel %vm818_vm8, %v554_v27, %v559_v30  ;;  %v151_v59 = vsel %vm818_vm8, %v559_v30, %v554_v27  ;;  %v159_v0 = vsub.f32 %v146_v55, %v152_v7  ;;  %v161_v2 = vsub.f32 %v147_v56, %v560_v8  ;;  %v595_v8 = vld [vmem:[%s1132_s1 + $0xa0] sm:$0xff] }
  0x1e   :  { %631 = vrsqrt.f32 %v858_v15  ;;  %v174_v3 = vmul.f32 %v628_v4, %v750_v9  ;;  %v563_v12 = vadd.f32 -1.0, %v150_v14  ;;  %v204_v17 = vmul.f32 %v151_v59, %v151_v59  ;;  %v933_v4 = vld [vmem:[%s1131_s0 + $0xa8] sm:$0xff] }
  0x1f   :  { %633 = vrsqrt.f32 %v861_v18  ;;  %v209_v20 = vmul.f32 %v208_v13, %v32_v53  ;;  %v193_v27 = vmul.f32 %v630_v63, %v752_v10  ;;  %v266_v30 = vmul.f32 %v265_v58, %v265_v58  ;;  %v920_v53 = vld [vmem:[%s1131_s0 + $0xa0] sm:$0xff]  ;;  %v598_v13 = vld [vmem:[%s1132_s1 + $0xa8] sm:$0xff] }
  0x20   :  { %v278_v31 = vmul.f32 %v277_v6, %v277_v6  ;;  %v160_v34 = vmul.f32 %v159_v0, %v159_v0  ;;  %v162_v35 = vmul.f32 %v161_v2, %v161_v2  ;;  %v203_v37 = vmul.f32 %v563_v12, %v563_v12  ;;  %v963_v63 = vld [vmem:[%s1135_s3] sm:$0xff] }
  0x21   :  { %v205_v39 = vmul.f32 %v204_v17, %v666_v1  ;;  %vm167_vm12 = vcmp.eq.f32.partialorder %v858_v15, inf  ;;  %v176_v46 = vsel %vm175_vm7, %v750_v9, %v174_v3  ;;  %v255_v47 = vadd.f32 %v254_v11, %v243_v29  ;;  %v955_v9 = vld [vmem:[%s1131_s0 + $0xb0] sm:$0xff]  ;;  %v973_v17 = vld [vmem:[%s1131_s0 + $0xb8] sm:$0xff] }
  0x22   :  { %vm169_vm13 = vcmp.eq.f32.partialorder %v858_v15, 0.0  ;;  %v460_v50 = vmul.f32 %v203_v37, %v666_v1  ;;  %v290_v52 = vmul.f32 %v289_v22, %v289_v22  ;;  %v195_v54 = vsel %vm194_vm10, %v752_v10, %v193_v27 }
  0x23   :  { %v210_v51 = vadd.f32 %v209_v20, %v205_v39  ;;  %v267_v55 = vadd.f32 %v266_v30, %v255_v47  ;;  %v313_v56 = vsub.f32 %v896_v33, %v589_v40  ;;  %v325_v7 = vsub.f32 %v905_v41, %v592_v42  ;;  %v604_v20 = vld [vmem:[%s1132_s1 + $0xb8] sm:$0xff] }
  0x24   :  { %v163_v57 = vadd.f32 %v162_v35, %v160_v34  ;;  %v170_v58 = vand.u32 2147483648, %v858_v15  ;;  %v179_v6 = vsel %vm177_vm9, %v178_v45, %v176_v46  ;;  %vm186_vm14 = vcmp.eq.f32.partialorder %v861_v18, inf  ;;  %473 = vst [vmem:[%s1134_s4 + $0x8] sm:$0xff] %v460_v50  ;;  %v601_v45 = vld [vmem:[%s1132_s1 + $0xb0] sm:$0xff]  ;;  %v607_v50 = vld [vmem:[%s1132_s1 + $0xc0] sm:$0xff] }
  0x25   :  { %474 = vst [vmem:[%s1134_s4 + $0x10] sm:$0xff] %v210_v51  ;;  %vm188_vm15 = vcmp.eq.f32.partialorder %v861_v18, 0.0  ;;  %v189_v59 = vand.u32 2147483648, %v861_v18  ;;  %v279_v60 = vadd.f32 %v278_v31, %v267_v55  ;;  %v302_v62 = vmul.f32 %v301_v48, %v301_v48  ;;  %v1000_v48 = vld [vmem:[%s1131_s0 + $0xc0] sm:$0xff] }
  0x26   :  { %v198_v3 = vsel %vm196_vm11, %v197_v5, %v195_v54  ;;  %v337_v11 = vsub.f32 %v920_v53, %v595_v8  ;;  %v349_v12 = vsub.f32 %v933_v4, %v598_v13  ;;  %v314_v27 = vmul.f32 %v313_v56, %v313_v56  ;;  %v610_v8 = vld [vmem:[%s1132_s1 + $0xc8] sm:$0xff] }
  0x27   :  { %v291_v25 = vadd.f32 %v290_v52, %v279_v60  ;;  %v326_v29 = vmul.f32 %v325_v7, %v325_v7  ;;  %v361_v5 = vsub.f32 %v955_v9, %v601_v45  ;;  %vm220_vm0 = vcmp.gt.f32.partialorder %v763_v23, %v963_v63  ;;  %v1014_v7 = vld [vmem:[%s1131_s0 + $0xc8] sm:$0xff] }
  0x28   :  { %v632_v14 = vpop.eup %631  ;;  %vm232_vm1 = vcmp.gt.f32.partialorder %v771_v24, %v963_v63  ;;  %v373_v35 = vsub.f32 %v973_v17, %v604_v20  ;;  %v338_v40 = vmul.f32 %v337_v11, %v337_v11  ;;  %v350_v42 = vmul.f32 %v349_v12, %v349_v12 }
  0x29   :  { %v634_v0 = vpop.eup %633  ;;  %v166_v2 = vmul.f32 %v632_v14, %v858_v15  ;;  %v303_v34 = vadd.f32 %v302_v62, %v291_v25  ;;  %v566_v24 = vsel %vm220_vm0, 1.0, %v637_v36  ;;  %vm244_vm2 = vcmp.gt.f32.partialorder %v794_v32, %v963_v63  ;;  %v1028_v14 = vld [vmem:[%s1131_s0 + $0xd0] sm:$0xff]  ;;  %v1056_v25 = vld [vmem:[%s1131_s0 + $0xe0] sm:$0xff] }
  0x2a   :  { %v185_v22 = vmul.f32 %v634_v0, %v861_v18  ;;  %vm256_vm3 = vcmp.gt.f32.partialorder %v806_v38, %v963_v63  ;;  %v572_v54 = vsel %vm244_vm2, 1.0, %v637_v36  ;;  %vm268_vm4 = vcmp.gt.f32.partialorder %v816_v43, %v963_v63 }
  0x2b   :  { %v168_v10 = vsel %vm167_vm12, %v858_v15, %v166_v2  ;;  %v315_v46 = vadd.f32 %v314_v27, %v303_v34  ;;  %v569_v15 = vsel %vm232_vm1, 1.0, %v637_v36  ;;  %v575_v55 = vsel %vm256_vm3, 1.0, %v637_v36  ;;  %v1041_v2 = vld [vmem:[%s1131_s0 + $0xd8] sm:$0xff]  ;;  %v619_v27 = vld [vmem:[%s1132_s1 + $0xe0] sm:$0xff] }
  0x2c   :  { %v171_v30 = vsel %vm169_vm13, %v170_v58, %v168_v10  ;;  %v187_v31 = vsel %vm186_vm14, %v861_v18, %v185_v22  ;;  %v235_v18 = vadd.f32 %v569_v15, %v566_v24  ;;  %vm280_vm5 = vcmp.gt.f32.partialorder %v829_v49, %v963_v63 }
  0x2d   :  { %v180_v37 = vsub.f32 %v171_v30, %v179_v6  ;;  %v190_v39 = vsel %vm188_vm15, %v189_v59, %v187_v31  ;;  %v327_v52 = vadd.f32 %v326_v29, %v315_v46  ;;  %v362_v13 = vmul.f32 %v361_v5, %v361_v5  ;;  %v613_v59 = vld [vmem:[%s1132_s1 + $0xd0] sm:$0xff]  ;;  %v621_v30 = vld [vmem:[%s1131_s0 + $0xe8] sm:$0xff] }
  0x2e   :  { %v199_v23 = vsub.f32 %v190_v39, %v198_v3  ;;  %v247_v32 = vadd.f32 %v572_v54, %v235_v18  ;;  %v578_v58 = vsel %vm268_vm4, 1.0, %v637_v36  ;;  %vm292_vm6 = vcmp.gt.f32.partialorder %v873_v61, %v963_v63  ;;  %v616_v3 = vld [vmem:[%s1132_s1 + $0xd8] sm:$0xff]  ;;  %v622_v31 = vld [vmem:[%s1132_s1 + $0xe8] sm:$0xff] }
  0x2f   :  { %v181_v47 = vmul.f32 %v180_v37, %v180_v37  ;;  %v339_v38 = vadd.f32 %v338_v40, %v327_v52  ;;  %v374_v60 = vmul.f32 %v373_v35, %v373_v35  ;;  %v397_v62 = vsub.f32 %v1014_v7, %v610_v8 }
  0x30   :  { %v200_v51 = vmul.f32 %v199_v23, %v199_v23  ;;  %v259_v43 = vadd.f32 %v575_v55, %v247_v32  ;;  %v581_v45 = vsel %vm280_vm5, 1.0, %v637_v36  ;;  %vm304_vm7 = vcmp.gt.f32.partialorder %v887_v16, %v963_v63 }
  0x31   :  { %v182_v56 = vadd.f32 %v181_v47, %v163_v57  ;;  %v385_v57 = vsub.f32 %v1000_v48, %v607_v50  ;;  %v351_v49 = vadd.f32 %v350_v42, %v339_v38  ;;  %v409_v20 = vsub.f32 %v1028_v14, %v613_v59 }
  0x32   :  { %v271_v11 = vadd.f32 %v578_v58, %v259_v43  ;;  %v584_v22 = vsel %vm292_vm6, 1.0, %v637_v36  ;;  %vm316_vm9 = vcmp.gt.f32.partialorder %v896_v33, %v963_v63  ;;  %v398_v10 = vmul.f32 %v397_v62, %v397_v62 }
  0x33   :  { %v201_v6 = vadd.f32 %v200_v51, %v182_v56  ;;  %v363_v61 = vadd.f32 %v362_v13, %v351_v49  ;;  %v386_v12 = vmul.f32 %v385_v57, %v385_v57  ;;  %v421_v5 = vsub.f32 %v1041_v2, %v616_v3 }
  0x34   :  { %v283_v16 = vadd.f32 %v581_v45, %v271_v11  ;;  %v587_v34 = vsel %vm304_vm7, 1.0, %v637_v36  ;;  %vm328_vm10 = vcmp.gt.f32.partialorder %v905_v41, %v963_v63  ;;  %v410_v33 = vmul.f32 %v409_v20, %v409_v20 }
  0x35   :  { %v458_v0 = vmul.f32 %v201_v6, %v666_v1  ;;  %v375_v29 = vadd.f32 %v374_v60, %v363_v61  ;;  %v433_v39 = vsub.f32 %v1056_v25, %v619_v27  ;;  %v590_v40 = vsel %vm316_vm9, 1.0, %v637_v36 }
  0x36   :  { %v295_v35 = vadd.f32 %v584_v22, %v283_v16  ;;  %v445_v42 = vsub.f32 %v621_v30, %v622_v31  ;;  %vm340_vm11 = vcmp.gt.f32.partialorder %v920_v53, %v963_v63  ;;  %v422_v24 = vmul.f32 %v421_v5, %v421_v5 }
  0x37   :  { %472 = vst [vmem:[%s1134_s4] sm:$0xff] %v458_v0  ;;  %v387_v37 = vadd.f32 %v386_v12, %v375_v29  ;;  %v593_v15 = vsel %vm328_vm10, 1.0, %v637_v36  ;;  %v141_v41 = vsel %vm818_vm8, %v757_v21, %v783_v28  ;;  %vm352_vm12 = vcmp.gt.f32.partialorder %v933_v4, %v963_v63 }
  0x38   :  { %v307_v23 = vadd.f32 %v587_v34, %v295_v35  ;;  %635 = vrcp.f32 %v141_v41  ;;  %v434_v18 = vmul.f32 %v433_v39, %v433_v39  ;;  %v596_v51 = vsel %vm340_vm11, 1.0, %v637_v36 }
  0x39   :  { %v399_v46 = vadd.f32 %v398_v10, %v387_v37  ;;  %vm364_vm13 = vcmp.gt.f32.partialorder %v955_v9, %v963_v63  ;;  %v446_v54 = vmul.f32 %v445_v42, %v445_v42  ;;  %v599_v55 = vsel %vm352_vm12, 1.0, %v637_v36 }
  0x3a   :  { %v319_v47 = vadd.f32 %v590_v40, %v307_v23  ;;  %vm376_vm14 = vcmp.gt.f32.partialorder %v973_v17, %v963_v63  ;;  %v602_v28 = vsel %vm364_vm13, 1.0, %v637_v36  ;;  %vm388_vm15 = vcmp.gt.f32.partialorder %v1000_v48, %v963_v63 }
  0x3b   :  { %v411_v50 = vadd.f32 %v410_v33, %v399_v46  ;;  %v605_v32 = vsel %vm376_vm14, 1.0, %v637_v36  ;;  %vm400_vm0 = vcmp.gt.f32.partialorder %v1014_v7, %v963_v63  ;;  %v140_v9 = vsel %vm818_vm8, %v754_v19, %v776_v26 }
  0x3c   :  { %v331_v52 = vadd.f32 %v593_v15, %v319_v47  ;;  %v608_v13 = vsel %vm388_vm15, 1.0, %v637_v36  ;;  %vm412_vm1 = vcmp.gt.f32.partialorder %v1028_v14, %v963_v63  ;;  %vm142_vm2 = vcmp.ne.f32.partialorder %v141_v41, 0.0 }
  0x3d   :  { %v423_v53 = vadd.f32 %v422_v24, %v411_v50  ;;  %v611_v48 = vsel %vm400_vm0, 1.0, %v637_v36  ;;  %vm424_vm8 = vcmp.gt.f32.partialorder %v1041_v2, %v963_v63  ;;  %v614_v19 = vsel %vm412_vm1, 1.0, %v637_v36 }
  0x3e   :  { %v343_v56 = vadd.f32 %v596_v51, %v331_v52  ;;  %vm436_vm3 = vcmp.gt.f32.partialorder %v1056_v25, %v963_v63  ;;  %v617_v59 = vsel %vm424_vm8, 1.0, %v637_v36  ;;  %vm448_vm4 = vcmp.gt.f32.partialorder %v621_v30, %v963_v63 }
  0x3f   :  { %v435_v21 = vadd.f32 %v434_v18, %v423_v53  ;;  %v620_v49 = vsel %vm436_vm3, 1.0, %v637_v36  ;;  %v623_v62 = vsel %vm448_vm4, 1.0, %v637_v36 }
  0x40   :  { %v355_v4 = vadd.f32 %v599_v55, %v343_v56 }
  0x41   :  { %v447_v8 = vadd.f32 %v446_v54, %v435_v21 }
  0x42   :  { %v367_v38 = vadd.f32 %v602_v28, %v355_v4  ;;  %v636_v57 = vpop.eup %635 }
  0x43   :  { %v463_v17 = vmul.f32 %v447_v8, %v666_v1  ;;  %v144_v7 = vmul.f32 %v636_v57, %v140_v9 }
  0x44   :  { %v379_v58 = vadd.f32 %v605_v32, %v367_v38 }
  0x45   :  { %475 = vst [vmem:[%s1134_s4 + $0x18] sm:$0xff] %v463_v17  ;;  %v145_v26 = vsel %vm142_vm2, %v144_v7, 0.0 }
  0x46   :  { %v391_v6 = vadd.f32 %v608_v13, %v379_v58  ;;  %v470_v14 = vmul.f32 %v145_v26, %v666_v1 }
  0x48   :  { %v403_v44 = vadd.f32 %v611_v48, %v391_v6  ;;  %479 = vst [vmem:[%s1134_s4 + $0x38] sm:$0xff] %v470_v14 }
  0x4a   :  { %v415_v43 = vadd.f32 %v614_v19, %v403_v44 }
  0x4c   :  { %v427_v60 = vadd.f32 %v617_v59, %v415_v43 }
  0x4e   :  { %v439_v45 = vadd.f32 %v620_v49, %v427_v60 }
  0x50   :  { %v451_v0 = vadd.f32 %v623_v62, %v439_v45 }
  0x52   :  { %vm452_vm5 = vcmp.lt.f32.partialorder %v451_v0, 1.0  ;;  %vm455_vm6 = vcmp.lt.f32.partialorder %v451_v0, 5.0 }
  0x53   :  { %v624_v2 = vsel %vm452_vm5, 1.0, %v637_v36  ;;  %v625_v3 = vsel %vm455_vm6, 1.0, %v637_v36 }
  0x54   :  { %v466_v11 = vmul.f32 %v624_v2, %v666_v1  ;;  %v468_v63 = vmul.f32 %v625_v3, %v666_v1 }
  0x56   :  { %477 = vst [vmem:[%s1134_s4 + $0x28] sm:$0xff] %v466_v11  ;;  %478 = vst [vmem:[%s1134_s4 + $0x30] sm:$0xff] %v468_v63 }

</bundles_post_ra>
